<compile_context>
chip_gen: v5e
topology: v5e:2x2
jax: 0.10.0
libtpu: 0.0.40
codegen_flags: <defaults>
</compile_context>

<pallas_src>
import jax
import jax.numpy as jnp
from jax.experimental import pallas as pl
from jax.experimental.pallas import tpu as pltpu


def _round_up(n, m):
    return ((n + m - 1) // m) * m


def deepfm_kernel(xl_ref, hist_ref, tcol_ref, selx_ref, selh_ref, sgrp_ref,
                  w1a_ref, w1b_ref, sc1_ref, sh1_ref,
                  w2_ref, sc2_ref, sh2_ref, w3_ref, b3_ref, out_ref):
    xl = xl_ref[...]              # (TB, F*E + 1)  f32, valid_len in last col
    hist = hist_ref[...]          # (TB, T*IF*E)   f32, lane-dense

    fe = xl.shape[1] - 1
    lens = xl[:, fe:]                                   # (TB, 1)
    lens_safe = jnp.where(lens != 0.0, lens, 1.0)       # (TB, 1)

    # ---- masked history mean (lane-dense, no cross-sublane reduce) ----------
    # wt[b, c] = (t(c) < valid_len[b]) / max(valid_len[b], 1); 1/len folded
    # into the mask weight via the EUP reciprocal.
    wt = jnp.where(tcol_ref[...] < lens,
                   pl.reciprocal(lens_safe, approx=True), 0.0)   # (TB, T*IF*E)
    weighted = hist * wt
    # group-sum over T via a constant 0/1 selector matmul (MXU, free filler)
    hist_mean = jnp.dot(weighted, sgrp_ref[...],
                        preferred_element_type=jnp.float32)      # (TB, IF*E)

    # ---- FM second-order interaction ----------------------------------------
    # sum_emb[b, d] = sum over all (X and hist_mean) features of dim d.  The
    # selector matmul is split so [X, hist_mean] is never concatenated; the
    # lens column hits a zero selector row and contributes nothing.
    sum_emb = (jnp.dot(xl, selx_ref[...], preferred_element_type=jnp.float32)
               + jnp.dot(hist_mean, selh_ref[...],
                         preferred_element_type=jnp.float32))    # (TB, E)
    # subtract lens^2 to cancel the packed lens column from the square sum
    sq_sum = (jnp.sum(xl * xl, axis=1, keepdims=True) - lens * lens
              + jnp.sum(hist_mean * hist_mean, axis=1, keepdims=True))
    fm_logit = 0.5 * (jnp.sum(sum_emb * sum_emb, axis=1, keepdims=True)
                      - sq_sum)                                   # (TB, 1)

    # ---- DNN: (Linear -> BN(eval) -> ReLU) x 2 -> Linear(., 1) ---------------
    # Linear biases folded into the BN shift (wrapper); bf16 MXU matmuls with
    # f32 accumulation; elementwise math stays f32.  w1a has a zero row for
    # the lens column, so xl can be fed whole.
    xl_bf = xl.astype(jnp.bfloat16)
    hm_bf = hist_mean.astype(jnp.bfloat16)
    z1 = (jnp.dot(xl_bf, w1a_ref[...], preferred_element_type=jnp.float32)
          + jnp.dot(hm_bf, w1b_ref[...], preferred_element_type=jnp.float32))
    h1 = jnp.maximum(z1 * sc1_ref[...] + sh1_ref[...], 0.0)      # (TB, H1P)
    z2 = jnp.dot(h1.astype(jnp.bfloat16), w2_ref[...],
                 preferred_element_type=jnp.float32)
    h2 = jnp.maximum(z2 * sc2_ref[...] + sh2_ref[...], 0.0)      # (TB, H2P)
    # final (H2, 1) layer as broadcast-multiply + lane reduce (no N=1 matmul)
    dnn_logit = (jnp.sum(h2 * w3_ref[...], axis=1, keepdims=True)
                 + b3_ref[...])                                    # (TB, 1)

    # y_pred = logit (sigmoid is never applied in the reference forward)
    out_ref[...] = fm_logit + dnn_logit


def deepfm_forward(X, hist_item, hist_valid_lens, params, *, tile_b=None):
    B, F, E = X.shape
    _, T, IF, _ = hist_item.shape
    FE, IFE, TIFE = F * E, IF * E, T * IF * E

    if tile_b is None:
        # Always aim for >=2 tiles (keeps both v7x TCs busy via the
        # "parallel" grid axis); cap at 2048 rows which, with the lane-dense
        # layout (~1.5 KB/row of double-buffered I/O plus body temporaries),
        # stays well inside the 48 MiB VMEM budget below on every generation
        # while amortizing the ~0.35 us per-grid-step overhead.
        half = _round_up(pl.cdiv(B, 2), 128)
        tile_b = int(min(2048, max(128, half)))

    num_tiles = pl.cdiv(B, tile_b)
    b_pad = num_tiles * tile_b

    # X slab with valid_lens packed as one extra column (one fewer DMA stream
    # and one fewer 128-lane-padded (TB,1) VMEM block).
    lens_col = hist_valid_lens.reshape(B, 1).astype(jnp.float32)
    x_flat = jnp.concatenate(
        [X.reshape(B, FE).astype(jnp.float32), lens_col], axis=1)  # (B, FE+1)
    hist_flat = hist_item.reshape(B, TIFE).astype(jnp.float32)     # (B, 96)
    if b_pad != B:
        pad = b_pad - B
        x_flat = jnp.pad(x_flat, ((0, pad), (0, 0)))
        hist_flat = jnp.pad(hist_flat, ((0, pad), (0, 0)))

    # Constant "t of column" row for the per-lane sequence mask.
    tcol = (jnp.arange(TIFE, dtype=jnp.int32) // IFE).astype(
        jnp.float32).reshape(1, TIFE)
    # Over-T group-sum selector: sgrp[t*IFE + d, d] = 1.
    sgrp = jnp.tile(jnp.eye(IFE, dtype=jnp.float32), (T, 1))        # (96, 16)
    # FM per-embedding-dim feature-sum selectors (X half gets a zero row for
    # the packed lens column).
    sel_x = jnp.concatenate(
        [jnp.tile(jnp.eye(E, dtype=jnp.float32), (F, 1)),
         jnp.zeros((1, E), jnp.float32)], axis=0)                   # (FE+1, E)
    sel_h = jnp.tile(jnp.eye(E, dtype=jnp.float32), (IF, 1))        # (IFE, E)

    # Fold BatchNorm(eval) + preceding Linear bias into one scale/shift pair,
    # zero-pad hidden dims to lane-friendly widths (exactness preserved).
    eps = 1e-5
    w1, w2, w3 = params["w1"], params["w2"], params["w3"]
    h1_dim, h2_dim = w1.shape[1], w2.shape[1]
    h1p, h2p = _round_up(h1_dim, 128), _round_up(h2_dim, 128)

    sc1 = params["gamma1"] / jnp.sqrt(params["var1"] + eps)
    sh1 = params["beta1"] + (params["b1"] - params["mean1"]) * sc1
    sc2 = params["gamma2"] / jnp.sqrt(params["var2"] + eps)
    sh2 = params["beta2"] + (params["b2"] - params["mean2"]) * sc2

    def pad_cols(a, n):
        return jnp.pad(a, ((0, 0), (0, n - a.shape[1])))

    w1p = pad_cols(w1.astype(jnp.float32), h1p)
    w1a = jnp.concatenate([w1p[:FE], jnp.zeros((1, h1p), jnp.float32)],
                          axis=0).astype(jnp.bfloat16)   # (FE+1, H1P), lens row = 0
    w1b = w1p[FE:].astype(jnp.bfloat16)                  # (IFE, H1P)
    w2p = jnp.pad(w2.astype(jnp.float32),
                  ((0, h1p - h1_dim), (0, h2p - h2_dim))).astype(jnp.bfloat16)
    sc1p = pad_cols(sc1.reshape(1, -1).astype(jnp.float32), h1p)
    sh1p = pad_cols(sh1.reshape(1, -1).astype(jnp.float32), h1p)
    sc2p = pad_cols(sc2.reshape(1, -1).astype(jnp.float32), h2p)
    sh2p = pad_cols(sh2.reshape(1, -1).astype(jnp.float32), h2p)
    w3row = pad_cols(w3.reshape(1, -1).astype(jnp.float32), h2p)
    b3 = params["b3"].reshape(1, 1).astype(jnp.float32)

    batch_args = (x_flat, hist_flat)
    batch_specs = [
        pl.BlockSpec((tile_b, FE + 1), lambda i: (i, 0)),
        pl.BlockSpec((tile_b, TIFE), lambda i: (i, 0)),
    ]
    weight_args = (tcol, sel_x, sel_h, sgrp, w1a, w1b, sc1p, sh1p,
                   w2p, sc2p, sh2p, w3row, b3)
    # Constant index_maps -> weights are fetched once and stay VMEM-resident.
    weight_specs = [
        pl.BlockSpec(a.shape, lambda i, _n=a.ndim: (0,) * _n)
        for a in weight_args
    ]

    # Only raise the scoped-VMEM limit when the large tiles actually need it
    # (48 MiB leaves headroom under v7x's 64 MiB physical per-TC VMEM).
    vmem_limit = 48 * 1024 * 1024 if tile_b > 1024 else None

    out = pl.pallas_call(
        deepfm_kernel,
        out_shape=jax.ShapeDtypeStruct((b_pad, 1), jnp.float32),
        grid=(num_tiles,),
        in_specs=batch_specs + weight_specs,
        out_specs=pl.BlockSpec((tile_b, 1), lambda i: (i, 0)),
        compiler_params=pltpu.CompilerParams(
            dimension_semantics=("parallel",),
            vmem_limit_bytes=vmem_limit),
    )(*batch_args, *weight_args)

    return out[:B]


def deepfm_reference(X, hist_item, hist_valid_lens, params):
    """Pure-JAX reference (eval semantics), mirrors the PyTorch forward."""
    B, F, E = X.shape
    _, T, IF, _ = hist_item.shape
    lens = hist_valid_lens.astype(jnp.float32)
    mask = (jnp.arange(T, dtype=jnp.float32)[None, :] < lens[:, None])
    hist_sum = jnp.sum(hist_item * mask[:, :, None, None].astype(jnp.float32),
                       axis=1)                                   # (B, IF, E)
    lens_safe = jnp.where(lens != 0.0, lens, 1.0)
    hist_mean = hist_sum / lens_safe[:, None, None]
    feats = jnp.concatenate([X, hist_mean], axis=1)              # (B, F+IF, E)

    sum_emb = jnp.sum(feats, axis=1)                             # (B, E)
    fm = 0.5 * jnp.sum(sum_emb ** 2 - jnp.sum(feats ** 2, axis=1),
                       axis=1, keepdims=True)

    flat = feats.reshape(B, -1)
    eps = 1e-5
    z1 = flat @ params["w1"] + params["b1"]
    h1 = jax.nn.relu((z1 - params["mean1"]) / jnp.sqrt(params["var1"] + eps)
                     * params["gamma1"] + params["beta1"])
    z2 = h1 @ params["w2"] + params["b2"]
    h2 = jax.nn.relu((z2 - params["mean2"]) / jnp.sqrt(params["var2"] + eps)
                     * params["gamma2"] + params["beta2"])
    dnn = h2 @ params["w3"] + params["b3"]
    return fm + dnn


def init_params(key, dnn_input_size, hidden_units=(200, 80), init_std=0.001):
    k1, k2, k3 = jax.random.split(key, 3)
    h1, h2 = hidden_units
    return {
        "w1": (jax.random.normal(k1, (dnn_input_size, h1), jnp.float32) * init_std),
        "b1": jnp.zeros((h1,), jnp.float32),
        "gamma1": jnp.ones((h1,), jnp.float32),
        "beta1": jnp.zeros((h1,), jnp.float32),
        "mean1": jnp.zeros((h1,), jnp.float32),
        "var1": jnp.ones((h1,), jnp.float32),
        "w2": (jax.random.normal(k2, (h1, h2), jnp.float32) * init_std),
        "b2": jnp.zeros((h2,), jnp.float32),
        "gamma2": jnp.ones((h2,), jnp.float32),
        "beta2": jnp.zeros((h2,), jnp.float32),
        "mean2": jnp.zeros((h2,), jnp.float32),
        "var2": jnp.ones((h2,), jnp.float32),
        "w3": (jax.random.normal(k3, (h2, 1), jnp.float32) * init_std),
        "b3": jnp.zeros((1,), jnp.float32),
    }


if __name__ == "__main__":
    # feature_num=4, item_feature_num=2, embed_size=8, history length T=6,
    # batch B=256 (two 128-row grid steps).  use_emb=False path: inputs are
    # already embeddings.
    B, F, IF, E, T = 256, 4, 2, 8, 6
    key = jax.random.PRNGKey(0)
    kx, kh, kl, kp = jax.random.split(key, 4)

    X = jax.random.normal(kx, (B, F, E), jnp.float32)
    hist_item = jax.random.normal(kh, (B, T, IF, E), jnp.float32)
    hist_valid_lens = jax.random.randint(kl, (B,), 0, T + 1)  # zeros -> clamp path

    params = init_params(kp, dnn_input_size=(F + IF) * E,
                         hidden_units=(200, 80), init_std=0.001)

    y_pred = deepfm_forward(X, hist_item, hist_valid_lens, params)
    jax.block_until_ready(y_pred)

    assert y_pred.shape == (B, 1) and bool(jnp.all(jnp.isfinite(y_pred)))

    # loose tolerance: kernel uses bf16 MXU matmuls + approx reciprocal
    y_ref = deepfm_reference(X, hist_item, hist_valid_lens, params)
    err = float(jnp.max(jnp.abs(y_pred - y_ref)))
    scale = float(jnp.max(jnp.abs(y_ref))) + 1.0
    assert err <= 5e-2 * scale, (err, scale)

    print("KERNEL_OK")
</pallas_src>

<mosaic_0001>
module attributes {stable_mosaic.version = 11 : i64} {
  func.func @deepfm_kernel(%arg0: i32, %arg1: memref<128x33xf32, #tpu.memory_space<vmem>>, %arg2: memref<128x96xf32, #tpu.memory_space<vmem>>, %arg3: memref<1x96xf32, #tpu.memory_space<vmem>>, %arg4: memref<33x8xf32, #tpu.memory_space<vmem>>, %arg5: memref<16x8xf32, #tpu.memory_space<vmem>>, %arg6: memref<96x16xf32, #tpu.memory_space<vmem>>, %arg7: memref<33x256xbf16, #tpu.memory_space<vmem>>, %arg8: memref<16x256xbf16, #tpu.memory_space<vmem>>, %arg9: memref<1x256xf32, #tpu.memory_space<vmem>>, %arg10: memref<1x256xf32, #tpu.memory_space<vmem>>, %arg11: memref<256x128xbf16, #tpu.memory_space<vmem>>, %arg12: memref<1x128xf32, #tpu.memory_space<vmem>>, %arg13: memref<1x128xf32, #tpu.memory_space<vmem>>, %arg14: memref<1x128xf32, #tpu.memory_space<vmem>>, %arg15: memref<1x1xf32, #tpu.memory_space<vmem>>, %arg16: memref<128x1xf32, #tpu.memory_space<vmem>>) attributes {dimension_semantics = [#tpu.dimension_semantics<parallel>], iteration_bounds = array<i64: 2>, scalar_prefetch = 0 : i64, scratch_operands = 0 : i64, tpu.core_type = #tpu.core_type<tc>, window_params = [{transform_indices = @transform_0, window_bounds = array<i64: 128, 33>}, {transform_indices = @transform_1, window_bounds = array<i64: 128, 96>}, {pipeline_mode = #tpu.pipeline_mode<synchronous>, transform_indices = @transform_2, window_bounds = array<i64: 1, 96>}, {pipeline_mode = #tpu.pipeline_mode<synchronous>, transform_indices = @transform_3, window_bounds = array<i64: 33, 8>}, {pipeline_mode = #tpu.pipeline_mode<synchronous>, transform_indices = @transform_4, window_bounds = array<i64: 16, 8>}, {pipeline_mode = #tpu.pipeline_mode<synchronous>, transform_indices = @transform_5, window_bounds = array<i64: 96, 16>}, {pipeline_mode = #tpu.pipeline_mode<synchronous>, transform_indices = @transform_6, window_bounds = array<i64: 33, 256>}, {pipeline_mode = #tpu.pipeline_mode<synchronous>, transform_indices = @transform_7, window_bounds = array<i64: 16, 256>}, {pipeline_mode = #tpu.pipeline_mode<synchronous>, transform_indices = @transform_8, window_bounds = array<i64: 1, 256>}, {pipeline_mode = #tpu.pipeline_mode<synchronous>, transform_indices = @transform_9, window_bounds = array<i64: 1, 256>}, {pipeline_mode = #tpu.pipeline_mode<synchronous>, transform_indices = @transform_10, window_bounds = array<i64: 256, 128>}, {pipeline_mode = #tpu.pipeline_mode<synchronous>, transform_indices = @transform_11, window_bounds = array<i64: 1, 128>}, {pipeline_mode = #tpu.pipeline_mode<synchronous>, transform_indices = @transform_12, window_bounds = array<i64: 1, 128>}, {pipeline_mode = #tpu.pipeline_mode<synchronous>, transform_indices = @transform_13, window_bounds = array<i64: 1, 128>}, {pipeline_mode = #tpu.pipeline_mode<synchronous>, transform_indices = @transform_14, window_bounds = array<i64: 1, 1>}, {transform_indices = @transform_15, window_bounds = array<i64: 128, 1>}]} {
    %c0 = arith.constant 0 : index
    %c0_0 = arith.constant 0 : index
    %0 = vector.load %arg1[%c0, %c0_0] : memref<128x33xf32, #tpu.memory_space<vmem>>, vector<128x33xf32>
    %c0_1 = arith.constant 0 : index
    %c0_2 = arith.constant 0 : index
    %1 = vector.load %arg2[%c0_1, %c0_2] : memref<128x96xf32, #tpu.memory_space<vmem>>, vector<128x96xf32>
    %2 = vector.extract_strided_slice %0 {offsets = [0, 32], sizes = [128, 1], strides = [1, 1]} : vector<128x33xf32> to vector<128x1xf32>
    %cst = arith.constant 0.000000e+00 : f32
    %3 = vector.broadcast %cst : f32 to vector<128x1xf32>
    %4 = arith.cmpf one, %2, %3 : vector<128x1xf32>
    %cst_3 = arith.constant 1.000000e+00 : f32
    %5 = vector.broadcast %cst_3 : f32 to vector<128x1xf32>
    %6 = arith.select %4, %2, %5 : vector<128x1xi1>, vector<128x1xf32>
    %c0_4 = arith.constant 0 : index
    %c0_5 = arith.constant 0 : index
    %7 = vector.load %arg3[%c0_4, %c0_5] : memref<1x96xf32, #tpu.memory_space<vmem>>, vector<1x96xf32>
    %8 = vector.broadcast %7 : vector<1x96xf32> to vector<128x96xf32>
    %9 = vector.broadcast %2 : vector<128x1xf32> to vector<128x96xf32>
    %10 = arith.cmpf olt, %8, %9 : vector<128x96xf32>
    %11 = tpu.reciprocal %6 {approx = true} : vector<128x1xf32> -> vector<128x1xf32>
    %cst_6 = arith.constant 0.000000e+00 : f32
    %12 = vector.shape_cast %11 : vector<128x1xf32> to vector<128x1xf32>
    %13 = vector.broadcast %12 : vector<128x1xf32> to vector<128x96xf32>
    %14 = vector.broadcast %cst_6 : f32 to vector<128x96xf32>
    %15 = arith.select %10, %13, %14 : vector<128x96xi1>, vector<128x96xf32>
    %16 = arith.mulf %1, %15 : vector<128x96xf32>
    %c0_7 = arith.constant 0 : index
    %c0_8 = arith.constant 0 : index
    %17 = vector.load %arg6[%c0_7, %c0_8] : memref<96x16xf32, #tpu.memory_space<vmem>>, vector<96x16xf32>
    %cst_9 = arith.constant dense<0.000000e+00> : vector<128x16xf32>
    %18 = tpu.matmul %16, %17, %cst_9 {dimension_numbers = #tpu.dot_dimension_numbers<[1], [0], [0], [1], [0, 0, 1, 1], [], []>} : vector<128x96xf32>, vector<96x16xf32>, vector<128x16xf32> -> vector<128x16xf32>
    %c0_10 = arith.constant 0 : index
    %c0_11 = arith.constant 0 : index
    %19 = vector.load %arg4[%c0_10, %c0_11] : memref<33x8xf32, #tpu.memory_space<vmem>>, vector<33x8xf32>
    %cst_12 = arith.constant dense<0.000000e+00> : vector<128x8xf32>
    %20 = tpu.matmul %0, %19, %cst_12 {dimension_numbers = #tpu.dot_dimension_numbers<[1], [0], [0], [1], [0, 0, 1, 1], [], []>} : vector<128x33xf32>, vector<33x8xf32>, vector<128x8xf32> -> vector<128x8xf32>
    %c0_13 = arith.constant 0 : index
    %c0_14 = arith.constant 0 : index
    %21 = vector.load %arg5[%c0_13, %c0_14] : memref<16x8xf32, #tpu.memory_space<vmem>>, vector<16x8xf32>
    %cst_15 = arith.constant dense<0.000000e+00> : vector<128x8xf32>
    %22 = tpu.matmul %18, %21, %cst_15 {dimension_numbers = #tpu.dot_dimension_numbers<[1], [0], [0], [1], [0, 0, 1, 1], [], []>} : vector<128x16xf32>, vector<16x8xf32>, vector<128x8xf32> -> vector<128x8xf32>
    %23 = arith.addf %20, %22 : vector<128x8xf32>
    %24 = arith.mulf %0, %0 : vector<128x33xf32>
    %cst_16 = arith.constant dense<0.000000e+00> : vector<128xf32>
    %25 = vector.multi_reduction <add>, %24, %cst_16 [1] : vector<128x33xf32> to vector<128xf32>
    %26 = vector.shape_cast %25 : vector<128xf32> to vector<128x1xf32>
    %27 = arith.mulf %2, %2 : vector<128x1xf32>
    %28 = arith.subf %26, %27 : vector<128x1xf32>
    %29 = arith.mulf %18, %18 : vector<128x16xf32>
    %cst_17 = arith.constant dense<0.000000e+00> : vector<128xf32>
    %30 = vector.multi_reduction <add>, %29, %cst_17 [1] : vector<128x16xf32> to vector<128xf32>
    %31 = vector.shape_cast %30 : vector<128xf32> to vector<128x1xf32>
    %32 = arith.addf %28, %31 : vector<128x1xf32>
    %33 = arith.mulf %23, %23 : vector<128x8xf32>
    %cst_18 = arith.constant dense<0.000000e+00> : vector<128xf32>
    %34 = vector.multi_reduction <add>, %33, %cst_18 [1] : vector<128x8xf32> to vector<128xf32>
    %35 = vector.shape_cast %34 : vector<128xf32> to vector<128x1xf32>
    %36 = arith.subf %35, %32 : vector<128x1xf32>
    %cst_19 = arith.constant 5.000000e-01 : f32
    %37 = vector.broadcast %cst_19 : f32 to vector<128x1xf32>
    %38 = arith.mulf %37, %36 : vector<128x1xf32>
    %39 = arith.truncf %0 : vector<128x33xf32> to vector<128x33xbf16>
    %40 = arith.truncf %18 : vector<128x16xf32> to vector<128x16xbf16>
    %c0_20 = arith.constant 0 : index
    %c0_21 = arith.constant 0 : index
    %41 = vector.load %arg7[%c0_20, %c0_21] : memref<33x256xbf16, #tpu.memory_space<vmem>>, vector<33x256xbf16>
    %cst_22 = arith.constant dense<0.000000e+00> : vector<128x256xf32>
    %42 = tpu.matmul %39, %41, %cst_22 {dimension_numbers = #tpu.dot_dimension_numbers<[1], [0], [0], [1], [0, 0, 1, 1], [], []>} : vector<128x33xbf16>, vector<33x256xbf16>, vector<128x256xf32> -> vector<128x256xf32>
    %c0_23 = arith.constant 0 : index
    %c0_24 = arith.constant 0 : index
    %43 = vector.load %arg8[%c0_23, %c0_24] : memref<16x256xbf16, #tpu.memory_space<vmem>>, vector<16x256xbf16>
    %cst_25 = arith.constant dense<0.000000e+00> : vector<128x256xf32>
    %44 = tpu.matmul %40, %43, %cst_25 {dimension_numbers = #tpu.dot_dimension_numbers<[1], [0], [0], [1], [0, 0, 1, 1], [], []>} : vector<128x16xbf16>, vector<16x256xbf16>, vector<128x256xf32> -> vector<128x256xf32>
    %45 = arith.addf %42, %44 : vector<128x256xf32>
    %c0_26 = arith.constant 0 : index
    %c0_27 = arith.constant 0 : index
    %46 = vector.load %arg9[%c0_26, %c0_27] : memref<1x256xf32, #tpu.memory_space<vmem>>, vector<1x256xf32>
    %47 = vector.broadcast %46 : vector<1x256xf32> to vector<128x256xf32>
    %48 = arith.mulf %45, %47 : vector<128x256xf32>
    %c0_28 = arith.constant 0 : index
    %c0_29 = arith.constant 0 : index
    %49 = vector.load %arg10[%c0_28, %c0_29] : memref<1x256xf32, #tpu.memory_space<vmem>>, vector<1x256xf32>
    %50 = vector.broadcast %49 : vector<1x256xf32> to vector<128x256xf32>
    %51 = arith.addf %48, %50 : vector<128x256xf32>
    %cst_30 = arith.constant 0.000000e+00 : f32
    %52 = vector.broadcast %cst_30 : f32 to vector<128x256xf32>
    %53 = arith.maximumf %51, %52 : vector<128x256xf32>
    %54 = arith.truncf %53 : vector<128x256xf32> to vector<128x256xbf16>
    %c0_31 = arith.constant 0 : index
    %c0_32 = arith.constant 0 : index
    %55 = vector.load %arg11[%c0_31, %c0_32] : memref<256x128xbf16, #tpu.memory_space<vmem>>, vector<256x128xbf16>
    %cst_33 = arith.constant dense<0.000000e+00> : vector<128x128xf32>
    %56 = tpu.matmul %54, %55, %cst_33 {dimension_numbers = #tpu.dot_dimension_numbers<[1], [0], [0], [1], [0, 0, 1, 1], [], []>} : vector<128x256xbf16>, vector<256x128xbf16>, vector<128x128xf32> -> vector<128x128xf32>
    %c0_34 = arith.constant 0 : index
    %c0_35 = arith.constant 0 : index
    %57 = vector.load %arg12[%c0_34, %c0_35] : memref<1x128xf32, #tpu.memory_space<vmem>>, vector<1x128xf32>
    %58 = vector.broadcast %57 : vector<1x128xf32> to vector<128x128xf32>
    %59 = arith.mulf %56, %58 : vector<128x128xf32>
    %c0_36 = arith.constant 0 : index
    %c0_37 = arith.constant 0 : index
    %60 = vector.load %arg13[%c0_36, %c0_37] : memref<1x128xf32, #tpu.memory_space<vmem>>, vector<1x128xf32>
    %61 = vector.broadcast %60 : vector<1x128xf32> to vector<128x128xf32>
    %62 = arith.addf %59, %61 : vector<128x128xf32>
    %cst_38 = arith.constant 0.000000e+00 : f32
    %63 = vector.broadcast %cst_38 : f32 to vector<128x128xf32>
    %64 = arith.maximumf %62, %63 : vector<128x128xf32>
    %c0_39 = arith.constant 0 : index
    %c0_40 = arith.constant 0 : index
    %65 = vector.load %arg14[%c0_39, %c0_40] : memref<1x128xf32, #tpu.memory_space<vmem>>, vector<1x128xf32>
    %66 = vector.broadcast %65 : vector<1x128xf32> to vector<128x128xf32>
    %67 = arith.mulf %64, %66 : vector<128x128xf32>
    %cst_41 = arith.constant dense<0.000000e+00> : vector<128xf32>
    %68 = vector.multi_reduction <add>, %67, %cst_41 [1] : vector<128x128xf32> to vector<128xf32>
    %69 = vector.shape_cast %68 : vector<128xf32> to vector<128x1xf32>
    %c0_42 = arith.constant 0 : index
    %c0_43 = arith.constant 0 : index
    %70 = vector.load %arg15[%c0_42, %c0_43] : memref<1x1xf32, #tpu.memory_space<vmem>>, vector<1x1xf32>
    %71 = vector.broadcast %70 : vector<1x1xf32> to vector<128x1xf32>
    %72 = arith.addf %69, %71 : vector<128x1xf32>
    %73 = arith.addf %38, %72 : vector<128x1xf32>
    %c0_44 = arith.constant 0 : index
    %c0_45 = arith.constant 0 : index
    %74 = vector.load %arg16[%c0_44, %c0_45] : memref<128x1xf32, #tpu.memory_space<vmem>>, vector<128x1xf32>
    tpu.vector_store %arg16[%c0_44, %c0_45], %73 {strides = array<i32>} : memref<128x1xf32, #tpu.memory_space<vmem>>, vector<128x1xf32>,
    return
  }
  func.func @transform_0(%arg0: i32) -> (i32, i32) {
    %c0_i32 = arith.constant 0 : i32
    %c0_i32_0 = arith.constant 0 : i32
    return %arg0, %c0_i32 : i32, i32
  }
  func.func @transform_1(%arg0: i32) -> (i32, i32) {
    %c0_i32 = arith.constant 0 : i32
    %c0_i32_0 = arith.constant 0 : i32
    return %arg0, %c0_i32 : i32, i32
  }
  func.func @transform_2(%arg0: i32) -> (i32, i32) {
    %c0_i32 = arith.constant 0 : i32
    %c0_i32_0 = arith.constant 0 : i32
    %c0_i32_1 = arith.constant 0 : i32
    return %c0_i32, %c0_i32_0 : i32, i32
  }
  func.func @transform_3(%arg0: i32) -> (i32, i32) {
    %c0_i32 = arith.constant 0 : i32
    %c0_i32_0 = arith.constant 0 : i32
    %c0_i32_1 = arith.constant 0 : i32
    return %c0_i32, %c0_i32_0 : i32, i32
  }
  func.func @transform_4(%arg0: i32) -> (i32, i32) {
    %c0_i32 = arith.constant 0 : i32
    %c0_i32_0 = arith.constant 0 : i32
    %c0_i32_1 = arith.constant 0 : i32
    return %c0_i32, %c0_i32_0 : i32, i32
  }
  func.func @transform_5(%arg0: i32) -> (i32, i32) {
    %c0_i32 = arith.constant 0 : i32
    %c0_i32_0 = arith.constant 0 : i32
    %c0_i32_1 = arith.constant 0 : i32
    return %c0_i32, %c0_i32_0 : i32, i32
  }
  func.func @transform_6(%arg0: i32) -> (i32, i32) {
    %c0_i32 = arith.constant 0 : i32
    %c0_i32_0 = arith.constant 0 : i32
    %c0_i32_1 = arith.constant 0 : i32
    return %c0_i32, %c0_i32_0 : i32, i32
  }
  func.func @transform_7(%arg0: i32) -> (i32, i32) {
    %c0_i32 = arith.constant 0 : i32
    %c0_i32_0 = arith.constant 0 : i32
    %c0_i32_1 = arith.constant 0 : i32
    return %c0_i32, %c0_i32_0 : i32, i32
  }
  func.func @transform_8(%arg0: i32) -> (i32, i32) {
    %c0_i32 = arith.constant 0 : i32
    %c0_i32_0 = arith.constant 0 : i32
    %c0_i32_1 = arith.constant 0 : i32
    return %c0_i32, %c0_i32_0 : i32, i32
  }
  func.func @transform_9(%arg0: i32) -> (i32, i32) {
    %c0_i32 = arith.constant 0 : i32
    %c0_i32_0 = arith.constant 0 : i32
    %c0_i32_1 = arith.constant 0 : i32
    return %c0_i32, %c0_i32_0 : i32, i32
  }
  func.func @transform_10(%arg0: i32) -> (i32, i32) {
    %c0_i32 = arith.constant 0 : i32
    %c0_i32_0 = arith.constant 0 : i32
    %c0_i32_1 = arith.constant 0 : i32
    return %c0_i32, %c0_i32_0 : i32, i32
  }
  func.func @transform_11(%arg0: i32) -> (i32, i32) {
    %c0_i32 = arith.constant 0 : i32
    %c0_i32_0 = arith.constant 0 : i32
    %c0_i32_1 = arith.constant 0 : i32
    return %c0_i32, %c0_i32_0 : i32, i32
  }
  func.func @transform_12(%arg0: i32) -> (i32, i32) {
    %c0_i32 = arith.constant 0 : i32
    %c0_i32_0 = arith.constant 0 : i32
    %c0_i32_1 = arith.constant 0 : i32
    return %c0_i32, %c0_i32_0 : i32, i32
  }
  func.func @transform_13(%arg0: i32) -> (i32, i32) {
    %c0_i32 = arith.constant 0 : i32
    %c0_i32_0 = arith.constant 0 : i32
    %c0_i32_1 = arith.constant 0 : i32
    return %c0_i32, %c0_i32_0 : i32, i32
  }
  func.func @transform_14(%arg0: i32) -> (i32, i32) {
    %c0_i32 = arith.constant 0 : i32
    %c0_i32_0 = arith.constant 0 : i32
    %c0_i32_1 = arith.constant 0 : i32
    return %c0_i32, %c0_i32_0 : i32, i32
  }
  func.func @transform_15(%arg0: i32) -> (i32, i32) {
    %c0_i32 = arith.constant 0 : i32
    %c0_i32_0 = arith.constant 0 : i32
    return %arg0, %c0_i32 : i32, i32
  }
}

</mosaic_0001>

<bundles_post_ra>
// kernel: tpu_custom_call.1
= control target key start
LH: loop header
LB: loop body
LE: loop exit
PB: predicated region body
PF: predicated region fallthrough
CT: control target
= control target key end

     0   :  { %s2791_s20 = smov 0   ;;  %s3928_s0 = inlined_call_operand.vmem [shape: f32[256,33], index: 0, kind: input, shape index: {}]   ;;  %s3929_s1 = inlined_call_operand.vmem [shape: f32[256,96], index: 1, kind: input, shape index: {}]   ;;  %s3930_s2 = inlined_call_operand.vmem [shape: f32[1,96], index: 2, kind: input, shape index: {}]   ;;  %s3931_s3 = inlined_call_operand.vmem [shape: f32[33,8], index: 3, kind: input, shape index: {}]   ;;  %s3932_s4 = inlined_call_operand.vmem [shape: f32[16,8], index: 4, kind: input, shape index: {}]   ;;  %s3933_s5 = inlined_call_operand.vmem [shape: f32[96,16], index: 5, kind: input, shape index: {}]   ;;  %s3934_s6 = inlined_call_operand.vmem [shape: bf16[33,256], index: 6, kind: input, shape index: {}]   ;;  %s3935_s7 = inlined_call_operand.vmem [shape: bf16[16,256], index: 7, kind: input, shape index: {}]   ;;  %s3936_s8 = inlined_call_operand.vmem [shape: f32[1,256], index: 8, kind: input, shape index: {}]   ;;  %s3937_s9 = inlined_call_operand.vmem [shape: f32[1,256], index: 9, kind: input, shape index: {}]   ;;  %s3938_s10 = inlined_call_operand.vmem [shape: bf16[256,128], index: 10, kind: input, shape index: {}]   ;;  %s3939_s11 = inlined_call_operand.vmem [shape: f32[1,128], index: 11, kind: input, shape index: {}]   ;;  %s3940_s12 = inlined_call_operand.vmem [shape: f32[1,128], index: 12, kind: input, shape index: {}]   ;;  %s3941_s13 = inlined_call_operand.vmem [shape: f32[1,128], index: 13, kind: input, shape index: {}]   ;;  %s3942_s14 = inlined_call_operand.<no memory space> [shape: f32[1,1], index: 14, kind: input, shape index: {}]   ;;  %s3943_s15 = inlined_call_operand.vmem [shape: f32[256,1], index: 15, kind: output, shape index: {}]  }
   0x1   :  { %v20_v0 = vstv %s3942_s14 }
   0x2   :  { %21 = vst [vmem:[#allocation2] sm:$0x1] %v20_v0 }
   0x3 LB: > { %s2438_s21 = sadd.s32 4294967295, %s2702_s20   ;;  %p2442_p0 = scmp.ge.s32.totalorder %s2702_s20, 1  ;;  %s2702_s20 = sphi %s2791_s20, %s27_s20  }
   0x4   : > { %p451_p1 = scmp.lt.s32.totalorder %s2702_s20, 3 }
   0x6   : > { %p452_p2 = pnand %p2442_p0, %p451_p1 }
   0x8   : > { %455 = sbr.rel (%p452_p2) target bundleno = 1242 (0x4da), region = 80 }
   0xd   : > { %s2443_s22 = sshll.u32 %s2438_s21, 4  ;;  %v2704_v1 = vmov 32   ;;  %v826_v46 = vld [vmem:[%s3933_s5 + $0x58] sm:$0xff]  ;;  %v825_v47 = vld [vmem:[%s3933_s5 + $0x50] sm:$0xff]  ;;  %v824_v51 = vld [vmem:[%s3933_s5 + $0x48] sm:$0xff]  ;;  %s2707_s26 = smov 96  }
   0xe   : > { %2658 = vset.pattern.permute.xlu2 %v2704_v1  ;;  %2657 = vset.pattern.permute.xlu1 %v2704_v1  ;;  %p505_p3 = scmp.lt.s32.totalorder %s2443_s22, 31  ;;  %v823_v52 = vld [vmem:[%s3933_s5 + $0x40] sm:$0xff]  ;;  %v822_v53 = vld [vmem:[%s3933_s5 + $0x38] sm:$0xff]  ;;  %v821_v55 = vld [vmem:[%s3933_s5 + $0x30] sm:$0xff] }
   0xf   : > { %2656 = vset.pattern.permute.xlu0 %v2704_v1  ;;  %880 = vmatpush.msra.mxu0 %v826_v46  ;;  %v820_v56 = vld [vmem:[%s3933_s5 + $0x28] sm:$0xff]  ;;  %v819_v57 = vld [vmem:[%s3933_s5 + $0x20] sm:$0xff]  ;;  %v818_v58 = vld [vmem:[%s3933_s5 + $0x18] sm:$0xff] }
  0x10   : > { %s3993_s22 = smov (!%p505_p3, %s2443_s22), 31  ;;  %v817_v59 = vld [vmem:[%s3933_s5 + $0x10] sm:$0xff]  ;;  %v816_v60 = vld [vmem:[%s3933_s5 + $0x8] sm:$0xff]  ;;  %v815_v61 = vld [vmem:[%s3933_s5] sm:$0xff] }
  0x11   : > { %s2799_s14 = sshll.u32 %s3993_s22, 3  ;;  %881 = vmatpush.msra.mxu0 %v825_v47  ;;  %v945_v62 = vld [vmem:[%s3931_s3 + $0x20] sm:$0x1]  ;;  %v944_v1 = vld [vmem:[%s3931_s3 + $0x18] sm:$0xff] }
  0x12   : > { %s2805_s25 = scalar_lea.vmem %s3928_s0, %s2799_s14  ;;  %v2945_v63 = vld [vmem:[%s3934_s6 + $0x20] sm:$0x11]  ;;  %s2979_s24 = scalar_lea.vmem %s3929_s1, %s2799_s14 }
  0x13   : > { %v2808_v2 = vld [vmem:[%s2805_s25 + $0x10] sm:$0xff]  ;;  %v2811_v3 = vld [vmem:[%s2805_s25 + $0x8] sm:$0xff]  ;;  %v2814_v4 = vld [vmem:[%s2805_s25] sm:$0xff]  ;;  %882 = vmatpush.msra.mxu0 %v824_v51  ;;  %v1589_v0 = vunpack.c.l.b16 %v2945_v63  ;;  %s3877_s29 = scalar_lea.vmem %s3943_s15, %s2799_s14 }
  0x14   : > { %603 = vperm.xlu2 %2658, %v2808_v2   ;;  %598 = vperm.xlu1 %2657, %v2811_v3   ;;  %vm557_vm0 = vcmp.ne.f32.partialorder %v2808_v2, 0.0  ;;  %vm556_vm1 = vcmp.ne.f32.partialorder %v2811_v3, 0.0  ;;  %vm555_vm2 = vcmp.ne.f32.partialorder %v2814_v4, 0.0  ;;  %v2822_v5 = vld [vmem:[%s2805_s25 + $0x18] sm:$0xff]  ;;  %v2831_v10 = vld [vmem:[%s2805_s25 + $0x28] sm:$0xff]  ;;  %v2834_v13 = vld [vmem:[%s2805_s25 + $0x20] sm:$0xff] }
  0x15   : > { %593 = vperm.xlu0 %2656, %v2814_v4   ;;  %v573_v6 = vsel %vm557_vm0, %v2808_v2, 1.0  ;;  %v572_v7 = vsel %vm556_vm1, %v2811_v3, 1.0  ;;  %v571_v8 = vsel %vm555_vm2, %v2814_v4, 1.0  ;;  %vm558_vm3 = vcmp.ne.f32.partialorder %v2822_v5, 0.0  ;;  %v2841_v18 = vld [vmem:[%s2805_s25 + $0x30] sm:$0xff]  ;;  %v2848_v21 = vld [vmem:[%s2805_s25 + $0x40] sm:$0xff]  ;;  %883 = vmatpush.msra.mxu0 %v823_v52 }
  0x16   : > { %2664 = vrcp.f32 %v573_v6  ;;  %v574_v9 = vsel %vm558_vm3, %v2822_v5, 1.0  ;;  %vm560_vm4 = vcmp.ne.f32.partialorder %v2831_v10, 0.0  ;;  %vm559_vm5 = vcmp.ne.f32.partialorder %v2834_v13, 0.0  ;;  %v2851_v23 = vld [vmem:[%s2805_s25 + $0x38] sm:$0xff]  ;;  %v2859_v27 = vld [vmem:[%s2805_s25 + $0x48] sm:$0xff]  ;;  %v2869_v32 = vld [vmem:[%s2805_s25 + $0x50] sm:$0xff] }
  0x17   : > { %2666 = vrcp.f32 %v572_v7  ;;  %v576_v15 = vsel %vm560_vm4, %v2831_v10, 1.0  ;;  %v575_v17 = vsel %vm559_vm5, %v2834_v13, 1.0  ;;  %vm561_vm6 = vcmp.ne.f32.partialorder %v2841_v18, 0.0  ;;  %v2866_v30 = vld [vmem:[%s2805_s25 + $0x58] sm:$0xff]  ;;  %v2877_v36 = vld [vmem:[%s2805_s25 + $0x60] sm:$0xff]  ;;  %v2884_v39 = vld [vmem:[%s2805_s25 + $0x70] sm:$0xff]  ;;  %884 = vmatpush.msra.mxu0 %v822_v53 }
  0x18   : > { %2668 = vrcp.f32 %v571_v8  ;;  %v577_v20 = vsel %vm561_vm6, %v2841_v18, 1.0  ;;  %vm563_vm7 = vcmp.ne.f32.partialorder %v2848_v21, 0.0  ;;  %vm562_vm8 = vcmp.ne.f32.partialorder %v2851_v23, 0.0  ;;  %v2887_v41 = vld [vmem:[%s2805_s25 + $0x68] sm:$0xff]  ;;  %v2895_v45 = vld [vmem:[%s2805_s25 + $0x78] sm:$0xff]  ;;  %v943_v6 = vld [vmem:[%s3931_s3 + $0x10] sm:$0xff] }
  0x19   : > { %2670 = vrcp.f32 %v574_v9  ;;  %v579_v24 = vsel %vm563_vm7, %v2848_v21, 1.0  ;;  %v578_v26 = vsel %vm562_vm8, %v2851_v23, 1.0  ;;  %vm564_vm9 = vcmp.ne.f32.partialorder %v2859_v27, 0.0  ;;  %885 = vmatpush.msra.mxu0 %v821_v55  ;;  %v544_v53 = vld [vmem:[%s2979_s24 + $0x28] sm:$0xff]  ;;  %s2706_s25 = smov 32  }
  0x1a   : > { %2672 = vrcp.f32 %v576_v15  ;;  %v580_v29 = vsel %vm564_vm9, %v2859_v27, 1.0  ;;  %vm566_vm10 = vcmp.ne.f32.partialorder %v2866_v30, 0.0  ;;  %vm565_vm11 = vcmp.ne.f32.partialorder %v2869_v32, 0.0 }
  0x1b   : > { %2674 = vrcp.f32 %v575_v17  ;;  %v582_v33 = vsel %vm566_vm10, %v2866_v30, 1.0  ;;  %v581_v35 = vsel %vm565_vm11, %v2869_v32, 1.0  ;;  %vm567_vm12 = vcmp.ne.f32.partialorder %v2877_v36, 0.0  ;;  %886 = vmatpush.msra.mxu0 %v820_v56  ;;  %v2973_v17 = vld [vmem:[%s3930_s2] ss:$0 sm:$0xff] }
  0x1c   : > { %v2665_v11 = vpop.eup %2664  ;;  %2676 = vrcp.f32 %v577_v20  ;;  %v583_v38 = vsel %vm567_vm12, %v2877_v36, 1.0  ;;  %vm569_vm13 = vcmp.ne.f32.partialorder %v2884_v39, 0.0  ;;  %vm568_vm14 = vcmp.ne.f32.partialorder %v2887_v41, 0.0 }
  0x1d   : > { %v2667_v12 = vpop.eup %2666  ;;  %715 = vperm.xlu2 %2658, %v2665_v11   ;;  %2678 = vrcp.f32 %v579_v24  ;;  %v585_v42 = vsel %vm569_vm13, %v2884_v39, 1.0  ;;  %v584_v44 = vsel %vm568_vm14, %v2887_v41, 1.0  ;;  %vm570_vm15 = vcmp.ne.f32.partialorder %v2895_v45, 0.0  ;;  %887 = vmatpush.msra.mxu0 %v819_v57 }
  0x1e   : > { %v2669_v14 = vpop.eup %2668  ;;  %710 = vperm.xlu1 %2657, %v2667_v12   ;;  %2680 = vrcp.f32 %v578_v26  ;;  %v586_v49 = vsel %vm570_vm15, %v2895_v45, 1.0  ;;  %vm1095_vm0 = vcmask 1040384   ;;  %v2954_v7 = vpack.c.b16 %v1589_v0, %v1589_v0  ;;  %v942_v12 = vld [vmem:[%s3931_s3 + $0x8] sm:$0xff] }
  0x1f   : > { %705 = vperm.xlu0 %2656, %v2669_v14   ;;  %v2671_v16 = vpop.eup %2670  ;;  %2682 = vrcp.f32 %v580_v29  ;;  %888 = vmatpush.msra.mxu0 %v818_v58  ;;  %v2705_v8 = vmov 0   ;;  %v941_v14 = vld [vmem:[%s3931_s3] sm:$0xff]  ;;  %vm1062_vm1 = vcmask 269312   ;;  %vm827_vm3 = vcmask 785408   ;;  %v545_v58 = vld [vmem:[%s2979_s24 + $0x30] sm:$0xff] }
  0x20   : > { %v2673_v19 = vpop.eup %2672  ;;  %2684 = vrcp.f32 %v582_v33  ;;  %2481 = vmatpush.msk.msra.mxu2 %vm1095_vm0, %v945_v62  ;;  %v2956_v9 = vsel %vm1095_vm0, 65535, %v2705_v8 }
  0x21   : > { %v2675_v22 = vpop.eup %2674  ;;  %2686 = vrcp.f32 %v581_v35  ;;  %889 = vmatpush.msra.mxu0 %v817_v59  ;;  %v1628_v11 = vand.u32 %v2956_v9, %v2954_v7  ;;  %v2620_v7 = vld [vmem:[%s3934_s6 + $0x4] sm:$0xf] }
  0x22   : > { %v2677_v25 = vpop.eup %2676  ;;  %2688 = vrcp.f32 %v583_v38  ;;  %1111 = vmatpush.msra.mxu2 %v944_v1 }
  0x23   : > { %v2679_v28 = vpop.eup %2678  ;;  %2690 = vrcp.f32 %v585_v42  ;;  %890 = vmatpush.msra.mxu0 %v816_v60  ;;  %v542_v42 = vld [vmem:[%s2979_s24 + $0x18] sm:$0xff] }
  0x24   : > { %v2681_v31 = vpop.eup %2680  ;;  %2692 = vrcp.f32 %v584_v44  ;;  %1112 = vmatpush.msra.mxu2 %v943_v6  ;;  %v546_v6 = vld [vmem:[%s2979_s24 + $0x38] sm:$0xff] }
  0x25   : > { %613 = vperm.xlu2 %2658, %v2834_v13   ;;  %v2683_v34 = vpop.eup %2682  ;;  %2694 = vrcp.f32 %v586_v49  ;;  %891 = vmatpush.msra.mxu0 %v815_v61  ;;  %v3017_v61 = vmul.f32 %v2814_v4, %v2814_v4 }
  0x26   : > { %720 = vperm.xlu1 %2657, %v2671_v16   ;;  %v2685_v37 = vpop.eup %2684  ;;  %1113 = vmatpush.msra.mxu2 %v942_v12 }
  0x27   : > { %608 = vperm.xlu0 %2656, %v2822_v5   ;;  %v2687_v40 = vpop.eup %2686  ;;  %v1180_v1 = vsel %vm1062_vm1, %v3017_v61, 0.0 }
  0x28   : > { %v2689_v43 = vpop.eup %2688  ;;  %1114 = vmatpush.msra.mxu2 %v941_v14 }
  0x29   : > { %v2691_v48 = vpop.eup %2690  ;;  %2482 = vmatmul.msk.f32.vlgmr.msra.gmra.mxu2 %vm1062_vm1, %v2814_v4 }
  0x2a   : > { %v2693_v50 = vpop.eup %2692 }
  0x2b   : > { %v2695_v54 = vpop.eup %2694 }
  0x2d   : > { %730 = vperm.xlu2 %2658, %v2673_v19   ;;  %v539_v19 = vld [vmem:[%s2979_s24] sm:$0xff] }
  0x2e   : > { %618 = vperm.xlu1 %2657, %v2831_v10  }
  0x2f   : > { %725 = vperm.xlu0 %2656, %v2675_v22  }
  0x31   : > { %2483 = vmatmul.msk.f32.gmra.mxu2 %vm1062_vm1, %v2811_v3 }
  0x35   : > { %628 = vperm.xlu2 %2658, %v2851_v23  }
  0x36   : > { %735 = vperm.xlu1 %2657, %v2677_v25  }
  0x37   : > { %623 = vperm.xlu0 %2656, %v2841_v18  }
  0x39   : > { %2484 = vmatmul.msk.f32.gmra.mxu2 %vm1062_vm1, %v2808_v2 }
  0x3d   : > { %745 = vperm.xlu2 %2658, %v2679_v28   ;;  %v540_v28 = vld [vmem:[%s2979_s24 + $0x8] sm:$0xff] }
  0x3e   : > { %633 = vperm.xlu1 %2657, %v2848_v21  }
  0x3f   : > { %740 = vperm.xlu0 %2656, %v2681_v31  }
  0x41   : > { %2485 = vmatmul.msk.f32.gmra.mxu2 %vm1062_vm1, %v2822_v5 }
  0x45   : > { %643 = vperm.xlu2 %2658, %v2869_v32  }
  0x46   : > { %750 = vperm.xlu1 %2657, %v2683_v34   ;;  %v541_v34 = vld [vmem:[%s2979_s24 + $0x10] sm:$0xff] }
  0x47   : > { %638 = vperm.xlu0 %2656, %v2859_v27  }
  0x49   : > { %2486 = vmatmul.msk.f32.gmra.mxu2 %vm1062_vm1, %v2834_v13 }
  0x4d   : > { %760 = vperm.xlu2 %2658, %v2685_v37  }
  0x4e   : > { %648 = vperm.xlu1 %2657, %v2866_v30  }
  0x4f   : > { %755 = vperm.xlu0 %2656, %v2687_v40  }
  0x51   : > { %2487 = vmatmul.msk.f32.gmra.mxu2 %vm1062_vm1, %v2831_v10 }
  0x55   : > { %658 = vperm.xlu2 %2658, %v2887_v41  }
  0x56   : > { %765 = vperm.xlu1 %2657, %v2689_v43  }
  0x57   : > { %653 = vperm.xlu0 %2656, %v2877_v36  }
  0x59   : > { %2488 = vmatmul.msk.f32.gmra.mxu2 %vm1062_vm1, %v2841_v18 }
  0x5d   : > { %775 = vperm.xlu2 %2658, %v2691_v48   ;;  %v543_v48 = vld [vmem:[%s2979_s24 + $0x20] sm:$0xff] }
  0x5e   : > { %663 = vperm.xlu1 %2657, %v2884_v39  }
  0x5f   : > { %770 = vperm.xlu0 %2656, %v2693_v50  }
  0x61   : > { %2489 = vmatmul.msk.f32.gmra.mxu2 %vm1062_vm1, %v2851_v23 }
  0x66   : > { %780 = vperm.xlu1 %2657, %v2695_v54  }
  0x67   : > { %668 = vperm.xlu0 %2656, %v2895_v45  }
  0x69   : > { %2490 = vmatmul.msk.f32.gmra.mxu2 %vm1062_vm1, %v2848_v21 }
  0x6e   : > { %v604_v25 = vpop.permute.xlu2 %603 }
  0x6f   : > { %vm673_vm5 = vcmp.lt.f32.partialorder %v2973_v17, %v604_v25 }
  0x71   : > { %2491 = vmatmul.msk.f32.gmra.mxu2 %vm1062_vm1, %v2859_v27 }
  0x77   : > { %v716_v33 = vpop.permute.xlu2 %715 }
  0x78   : > { %v785_v35 = vsel %vm673_vm5, %v716_v33, 0.0  ;;  %vm948_vm5 = vcmask 130048  }
  0x79   : > { %v801_v38 = vmul.f32 %v785_v35, %v541_v34  ;;  %2492 = vmatmul.msk.f32.gmra.mxu2 %vm1062_vm1, %v2869_v32  ;;  %v548_v34 = vld [vmem:[%s2979_s24 + $0x48] sm:$0xff] }
  0x7f   : > { %v614_v46 = vpop.permute.xlu2 %613 }
  0x80   : > { %vm675_vm7 = vcmp.lt.f32.partialorder %v2973_v17, %v614_v46 }
  0x81   : > { %2493 = vmatmul.msk.f32.gmra.mxu2 %vm1062_vm1, %v2866_v30 }
  0x86   : > { %v599_v16 = vpop.permute.xlu1 %598  ;;  %1181 = vadd.xlane.f32.xlu2 %v1180_v1 }
  0x87   : > { %v594_v15 = vpop.permute.xlu0 %593  ;;  %vm672_vm4 = vcmp.lt.f32.partialorder %v2973_v17, %v599_v16  ;;  %v731_v52 = vpop.permute.xlu2 %730 }
  0x88   : > { %vm671_vm2 = vcmp.lt.f32.partialorder %v2973_v17, %v594_v15  ;;  %v3028_v15 = vmul.f32 %v2822_v5, %v2822_v5 }
  0x89   : > { %2494 = vmatmul.msk.f32.gmra.mxu2 %vm1062_vm1, %v2877_v36 }
  0x8a   : > { %v1189_v16 = vsel %vm1062_vm1, %v3028_v15, 0.0 }
  0x8e   : > { %1190 = vadd.xlane.f32.xlu2 %v1189_v16 }
  0x8f   : > { %v629_v62 = vpop.permute.xlu2 %628 }
  0x90   : > { %v711_v26 = vpop.permute.xlu1 %710  ;;  %vm678_vm10 = vcmp.lt.f32.partialorder %v2973_v17, %v629_v62 }
  0x91   : > { %v706_v20 = vpop.permute.xlu0 %705  ;;  %v784_v29 = vsel %vm672_vm4, %v711_v26, 0.0  ;;  %v3039_v26 = vmul.f32 %v2834_v13, %v2834_v13  ;;  %2495 = vmatmul.msk.f32.gmra.mxu2 %vm1062_vm1, %v2887_v41 }
  0x92   : > { %v783_v22 = vsel %vm671_vm2, %v706_v20, 0.0  ;;  %v800_v31 = vmul.f32 %v784_v29, %v540_v28  ;;  %v547_v20 = vld [vmem:[%s2979_s24 + $0x40] sm:$0xff]  ;;  %v3043_v28 = vmul.f32 %v2811_v3, %v2811_v3 }
  0x93   : > { %v799_v24 = vmul.f32 %v783_v22, %v539_v19 }
  0x94   : > { %v1183_v33 = vsel %vm1062_vm1, %v3043_v28, 0.0 }
  0x95   : > { %2449 = vmatmul.msk.f32.vlgmr.msra.gmra.mxu0 %vm827_vm3, %v799_v24  ;;  %1184 = vadd.xlane.f32.xlu0 %v1183_v33 }
  0x97   : > { %v746_v19 = vpop.permute.xlu2 %745 }
  0x98   : > { %v721_v40 = vpop.permute.xlu1 %720 }
  0x99   : > { %v609_v37 = vpop.permute.xlu0 %608  ;;  %2496 = vmatmul.msk.f32.gmra.mxu2 %vm1062_vm1, %v2884_v39 }
  0x9a   : > { %vm674_vm6 = vcmp.lt.f32.partialorder %v2973_v17, %v609_v37 }
  0x9b   : > { %v786_v43 = vsel %vm674_vm6, %v721_v40, 0.0  ;;  %v3060_v40 = vmul.f32 %v2851_v23, %v2851_v23 }
  0x9c   : > { %v802_v44 = vmul.f32 %v786_v43, %v542_v42  ;;  %v3064_v42 = vmul.f32 %v2831_v10, %v2831_v10 }
  0x9d   : > { %2450 = vmatmul.msk.f32.gmra.mxu0 %vm827_vm3, %v800_v31  ;;  %v1192_v31 = vsel %vm1062_vm1, %v3039_v26, 0.0 }
  0x9e   : > { %1193 = vadd.xlane.f32.xlu2 %v1192_v31  ;;  %v946_v31 = vld [vmem:[%s3932_s4] sm:$0xff] }
  0x9f   : > { %v644_v43 = vpop.permute.xlu2 %643 }
  0xa0   : > { %v619_v50 = vpop.permute.xlu1 %618  ;;  %vm681_vm13 = vcmp.lt.f32.partialorder %v2973_v17, %v644_v43 }
  0xa1   : > { %v726_v47 = vpop.permute.xlu0 %725  ;;  %vm676_vm8 = vcmp.lt.f32.partialorder %v2973_v17, %v619_v50  ;;  %2497 = vmatmul.msk.f32.gmra.mxu2 %vm1062_vm1, %v2895_v45 }
  0xa2   : > { %v787_v49 = vsel %vm675_vm7, %v726_v47, 0.0  ;;  %v788_v54 = vsel %vm676_vm8, %v731_v52, 0.0  ;;  %v1201_v47 = vsel %vm1062_vm1, %v3060_v40, 0.0 }
  0xa3   : > { %v803_v51 = vmul.f32 %v787_v49, %v543_v48  ;;  %v804_v56 = vmul.f32 %v788_v54, %v544_v53  ;;  %v1195_v48 = vsel %vm1062_vm1, %v3064_v42, 0.0  ;;  %v549_v49 = vld [vmem:[%s2979_s24 + $0x50] sm:$0xff]  ;;  %v3079_v53 = vmul.f32 %v2841_v18, %v2841_v18 }
  0xa4   : > { %1196 = vadd.xlane.f32.xlu0 %v1195_v48  ;;  %v3083_v54 = vmul.f32 %v2869_v32, %v2869_v32  ;;  %v2500_v48 = vld [vmem:[%s3935_s7] sm:$0xf] }
  0xa5   : > { %2451 = vmatmul.msk.f32.gmra.mxu0 %vm827_vm3, %v801_v38  ;;  %v3056_v38 = vmul.f32 %v2808_v2, %v2808_v2 }
  0xa6   : > { %1202 = vadd.xlane.f32.xlu2 %v1201_v47 }
  0xa7   : > { %v1186_v46 = vsel %vm1062_vm1, %v3056_v38, 0.0 }
  0xa8   : > { %v736_v57 = vpop.permute.xlu1 %735  ;;  %1187 = vadd.xlane.f32.xlu1 %v1186_v46 }
  0xa9   : > { %v624_v55 = vpop.permute.xlu0 %623 }
  0xaa   : > { %vm677_vm9 = vcmp.lt.f32.partialorder %v2973_v17, %v624_v55  ;;  %v3087_v55 = vmul.f32 %v2848_v21, %v2848_v21 }
  0xab   : > { %v789_v59 = vsel %vm677_vm9, %v736_v57, 0.0  ;;  %v1210_v57 = vsel %vm1062_vm1, %v3083_v54, 0.0 }
  0xac   : > { %v805_v60 = vmul.f32 %v789_v59, %v545_v58  ;;  %v1204_v58 = vsel %vm1062_vm1, %v3087_v55, 0.0  ;;  %v761_v59 = vpop.permute.xlu2 %760 }
  0xad   : > { %2452 = vmatmul.msk.f32.gmra.mxu0 %vm827_vm3, %v802_v44  ;;  %1205 = vadd.xlane.f32.xlu0 %v1204_v58  ;;  %v3156_v58 = vmul.f32 %v2895_v45, %v2895_v45 }
  0xae   : > { %1211 = vadd.xlane.f32.xlu2 %v1210_v57 }
  0xaf   : > { %3954 = vst [vmem:[#allocation4_spill] sm:$0xff] %v3156_v58 }
  0xb0   : > { %v634_v12 = vpop.permute.xlu1 %633 }
  0xb1   : > { %v741_v0 = vpop.permute.xlu0 %740  ;;  %vm679_vm11 = vcmp.lt.f32.partialorder %v2973_v17, %v634_v12  ;;  %v3110_v12 = vmul.f32 %v2866_v30, %v2866_v30 }
  0xb2   : > { %v790_v8 = vsel %vm678_vm10, %v741_v0, 0.0  ;;  %v791_v22 = vsel %vm679_vm11, %v746_v19, 0.0 }
  0xb3   : > { %v806_v14 = vmul.f32 %v790_v8, %v546_v6  ;;  %v807_v25 = vmul.f32 %v791_v22, %v547_v20  ;;  %v3102_v6 = vmul.f32 %v2859_v27, %v2859_v27  ;;  %v3106_v8 = vmul.f32 %v2887_v41, %v2887_v41  ;;  %v947_v22 = vld [vmem:[%s3932_s4 + $0x8] sm:$0xff] }
  0xb4   : > { %v1213_v20 = vsel %vm1062_vm1, %v3110_v12, 0.0  ;;  %1011 = vmatpush.msra.mxu1 %v947_v22 }
  0xb5   : > { %2453 = vmatmul.msk.f32.gmra.mxu0 %vm827_vm3, %v803_v51  ;;  %v1207_v16 = vsel %vm1062_vm1, %v3102_v6, 0.0  ;;  %v1219_v19 = vsel %vm1062_vm1, %v3106_v8, 0.0  ;;  %1214 = vadd.xlane.f32.xlu0 %v1213_v20 }
  0xb6   : > { %1220 = vadd.xlane.f32.xlu2 %v1219_v19  ;;  %1012 = vmatpush.msra.mxu1 %v946_v31  ;;  %v554_v19 = vld [vmem:[%s2979_s24 + $0x78] sm:$0xff] }
  0xb8   : > { %v751_v29 = vpop.permute.xlu1 %750 }
  0xb9   : > { %v639_v24 = vpop.permute.xlu0 %638 }
  0xba   : > { %vm680_vm12 = vcmp.lt.f32.partialorder %v2973_v17, %v639_v24  ;;  %v1590_v24 = vunpack.c.h.b16 %v2945_v63  ;;  %v659_v63 = vpop.permute.xlu2 %658 }
  0xbb   : > { %v792_v35 = vsel %vm680_vm12, %v751_v29, 0.0  ;;  %vm684_vm0 = vcmp.lt.f32.partialorder %v2973_v17, %v659_v63  ;;  %v2624_v63 = vld [vmem:[%s3935_s7 + $0x4] sm:$0xf] }
  0xbc   : > { %v808_v37 = vmul.f32 %v792_v35, %v548_v34  ;;  %v1596_v33 = vpack.c.b16 %v1590_v24, %v1590_v24  ;;  %v3132_v35 = vmul.f32 %v2877_v36, %v2877_v36 }
  0xbd   : > { %2454 = vmatmul.msk.f32.gmra.mxu0 %vm827_vm3, %v804_v56  ;;  %v1198_v56 = vsel %vm1062_vm1, %v3079_v53, 0.0 }
  0xbe   : > { %1199 = vadd.xlane.f32.xlu1 %v1198_v56  ;;  %v1631_v47 = vand.u32 %v2956_v9, %v1596_v33  ;;  %v2526_v9 = vld [vmem:[%s3934_s6 + $0x8] sm:$0xf0] }
  0xc0   : > { %v649_v51 = vpop.permute.xlu1 %648 }
  0xc1   : > { %v756_v44 = vpop.permute.xlu0 %755  ;;  %vm682_vm14 = vcmp.lt.f32.partialorder %v2973_v17, %v649_v51 }
  0xc2   : > { %v793_v50 = vsel %vm681_vm13, %v756_v44, 0.0  ;;  %v794_v62 = vsel %vm682_vm14, %v761_v59, 0.0  ;;  %v1216_v44 = vsel %vm1062_vm1, %v3132_v35, 0.0  ;;  %v1225_v59 = vsel %vm1062_vm1, %v3156_v58, 0.0 }
  0xc3   : > { %v809_v52 = vmul.f32 %v793_v50, %v549_v49  ;;  %v2625_v49 = vld [vmem:[%s3935_s7 + $0x4] sm:$0xf0] }
  0xc4   : > { %v552_v50 = vld [vmem:[%s2979_s24 + $0x68] sm:$0xff] }
  0xc5   : > { %2455 = vmatmul.msk.f32.gmra.mxu0 %vm827_vm3, %v805_v60  ;;  %v550_v60 = vld [vmem:[%s2979_s24 + $0x58] sm:$0xff] }
  0xc6   : > { %v810_v1 = vmul.f32 %v794_v62, %v550_v60  ;;  %1208 = vadd.xlane.f32.xlu1 %v1207_v16  ;;  %v776_v60 = vpop.permute.xlu2 %775  ;;  %v553_v62 = vld [vmem:[%s2979_s24 + $0x70] sm:$0xff] }
  0xc9   : > { %v654_v0 = vpop.permute.xlu0 %653 }
  0xca   : > { %vm683_vm15 = vcmp.lt.f32.partialorder %v2973_v17, %v654_v0 }
  0xcd   : > { %2456 = vmatmul.msk.f32.gmra.mxu0 %vm827_vm3, %v806_v14  ;;  %v766_v14 = vpop.permute.xlu1 %765 }
  0xce   : > { %v795_v29 = vsel %vm683_vm15, %v766_v14, 0.0  ;;  %1217 = vadd.xlane.f32.xlu1 %v1216_v44 }
  0xd1   : > { %v771_v43 = vpop.permute.xlu0 %770 }
  0xd2   : > { %v796_v51 = vsel %vm684_vm0, %v771_v43, 0.0  ;;  %v2502_v43 = vld [vmem:[%s3935_s7 + $0x8] sm:$0xf0] }
  0xd3   : > { %v812_v57 = vmul.f32 %v796_v51, %v552_v50  ;;  %v2505_v44 = vor.u32 %v2624_v63, %v2502_v43 }
  0xd5   : > { %2457 = vmatmul.msk.f32.gmra.mxu0 %vm827_vm3, %v807_v25  ;;  %v551_v25 = vld [vmem:[%s2979_s24 + $0x60] sm:$0xff]  ;;  %v664_v56 = vpop.permute.xlu1 %663  ;;  %1534 = vmatpush.bf16.msrb.mxu1 %v2505_v44 }
  0xd6   : > { %v811_v34 = vmul.f32 %v795_v29, %v551_v25  ;;  %vm685_vm2 = vcmp.lt.f32.partialorder %v2973_v17, %v664_v56  ;;  %1226 = vadd.xlane.f32.xlu1 %v1225_v59 }
  0xd7   : > { %v797_v0 = vsel %vm685_vm2, %v776_v60, 0.0 }
  0xd8   : > { %v813_v14 = vmul.f32 %v797_v0, %v553_v62 }
  0xdd   : > { %2458 = vmatmul.msk.f32.gmra.mxu0 %vm827_vm3, %v808_v37  ;;  %v3136_v37 = vmul.f32 %v2884_v39, %v2884_v39  ;;  %v781_v16 = vpop.permute.xlu1 %780 }
  0xdf   : > { %3953 = vst [vmem:[#allocation3_spill] sm:$0xff] %v3136_v37  ;;  %v1222_v46 = vsel %vm1062_vm1, %v3136_v37, 0.0 }
  0xe0   : > { %1223 = vadd.xlane.f32.xlu0 %v1222_v46  ;;  %v3181_v46 = vpop.f32.mrf.mxu2 }
  0xe5   : > { %2459 = vmatmul.msk.f32.gmra.mxu0 %vm827_vm3, %v809_v52  ;;  %v2501_v52 = vor.u32 %v2625_v49, %v2500_v48 }
  0xe7   : > { %1485 = vmatpush.bf16.msrb.mxu2 %v2501_v52  ;;  %2642 = vmatpush.bf16.msra.mxu3 %v2501_v52 }
  0xe8   : > { %v3185_v51 = vpop.f32.mrf.mxu2 }
  0xeb   : > { %1687 = vmatpush.bf16.msra.mxu2 %v1631_v47  ;;  %2643 = vmatpush.bf16.msrb.mxu3 %v2505_v44 }
  0xed   : > { %2460 = vmatmul.msk.f32.gmra.mxu0 %vm827_vm3, %v810_v1  ;;  %v669_v1 = vpop.permute.xlu0 %668 }
  0xee   : > { %vm686_vm4 = vcmp.lt.f32.partialorder %v2973_v17, %v669_v1 }
  0xef   : > { %v798_v20 = vsel %vm686_vm4, %v781_v16, 0.0 }
  0xf0   : > { %v814_v22 = vmul.f32 %v798_v20, %v554_v19  ;;  %v3194_v62 = vpop.f32.mrf.mxu2 }
  0xf5   : > { %2461 = vmatmul.msk.f32.gmra.mxu0 %vm827_vm3, %v811_v34 }
  0xf8   : > { %v3206_v20 = vpop.f32.mrf.mxu2 }
  0xfd   : > { %2462 = vmatmul.msk.f32.gmra.mxu0 %vm827_vm3, %v812_v57 }
 0x105   : > { %2463 = vmatmul.msk.f32.gmra.mxu0 %vm827_vm3, %v813_v14 }
 0x10d   : > { %2464 = vmatmul.msk.f32.gmra.mxu0 %vm827_vm3, %v814_v22  ;;  %vm1340_vm3 = vcmask 64512  }
 0x112   : > { %v893_v24 = vpop.f32.mrf.mxu0 }
 0x113   : > { %2465 = vmatmul.msk.f32.vlgmr.msra.gmra.mxu1 %vm948_vm5, %v893_v24  ;;  %v1244_v25 = vmul.f32 %v893_v24, %v893_v24 }
 0x115   : > { %v1260_v29 = vsel %vm948_vm5, %v1244_v25, 0.0  ;;  %v2622_v25 = vld [vmem:[%s3934_s6 + $0x14] sm:$0xf] }
 0x116   : > { %1261 = vadd.xlane.f32.xlu2 %v1260_v29  ;;  %v2534_v29 = vld [vmem:[%s3934_s6 + $0x18] sm:$0xf0] }
 0x11a   : > { %v896_v31 = vpop.f32.mrf.mxu0 }
 0x11b   : > { %v3169_v33 = vpack.c.bf16 %v896_v31, %v893_v24  ;;  %2466 = vmatmul.msk.f32.gmra.mxu1 %vm948_vm5, %v896_v31  ;;  %v1245_v17 = vmul.f32 %v896_v31, %v896_v31  ;;  %v2537_v31 = vor.u32 %v2622_v25, %v2534_v29 }
 0x11d   : > { %2506 = vmatmul.msk.bf16.vlgmr.msrb.gmra.mxu2 %vm948_vm5, %v3169_v33  ;;  %v1263_v34 = vsel %vm948_vm5, %v1245_v17, 0.0 }
 0x11e   : > { %1264 = vadd.xlane.f32.xlu0 %v1263_v34  ;;  %1688 = vmatpush.bf16.msra.mxu2 %v2537_v31  ;;  %v3222_v34 = vpop.f32.mrf.mxu2  ;;  %v3266_v31 = vpop.xlane.xlu1 %1187 }
 0x122   : > { %v899_v47 = vpop.f32.mrf.mxu0 }
 0x123   : > { %2467 = vmatmul.msk.f32.gmra.mxu1 %vm948_vm5, %v899_v47  ;;  %v1246_v48 = vmul.f32 %v899_v47, %v899_v47 }
 0x125   : > { %v1266_v49 = vsel %vm948_vm5, %v1246_v48, 0.0 }
 0x126   : > { %1267 = vadd.xlane.f32.xlu1 %v1266_v49  ;;  %v3234_v49 = vpop.xlane.xlu2 %1181 }
 0x12a   : > { %v902_v50 = vpop.f32.mrf.mxu0 }
 0x12b   : > { %2468 = vmatmul.msk.f32.gmra.mxu1 %vm948_vm5, %v902_v50  ;;  %v3188_v52 = vpack.c.bf16 %v902_v50, %v899_v47  ;;  %v1247_v56 = vmul.f32 %v902_v50, %v902_v50  ;;  %v3229_v47 = vpack.c.bf16 %v2811_v3, %v2814_v4 }
 0x12d   : > { %2507 = vmatmul.msk.bf16.gmra.mxu2 %vm948_vm5, %v3188_v52  ;;  %v1269_v57 = vsel %vm948_vm5, %v1247_v56, 0.0  ;;  %v3238_v56 = vpop.f32.mrf.mxu2 }
 0x12e   : > { %1270 = vadd.xlane.f32.xlu2 %v1269_v57  ;;  %v3242_v4 = vpop.xlane.xlu2 %1190 }
 0x132   : > { %v905_v59 = vpop.f32.mrf.mxu0 }
 0x133   : > { %2469 = vmatmul.msk.f32.gmra.mxu1 %vm948_vm5, %v905_v59  ;;  %v1248_v60 = vmul.f32 %v905_v59, %v905_v59 }
 0x135   : > { %v1272_v0 = vsel %vm948_vm5, %v1248_v60, 0.0 }
 0x136   : > { %1273 = vadd.xlane.f32.xlu0 %v1272_v0 }
 0x13a   : > { %v908_v1 = vpop.f32.mrf.mxu0 }
 0x13b   : > { %2470 = vmatmul.msk.f32.gmra.mxu1 %vm948_vm5, %v908_v1  ;;  %v3198_v14 = vpack.c.bf16 %v908_v1, %v905_v59  ;;  %v1249_v16 = vmul.f32 %v908_v1, %v908_v1  ;;  %v3249_v1 = vpack.c.bf16 %v2822_v5, %v2808_v2 }
 0x13d   : > { %2508 = vmatmul.msk.bf16.vlgmr.msra.gmra.mxu3 %vm948_vm5, %v3198_v14  ;;  %v1275_v19 = vsel %vm948_vm5, %v1249_v16, 0.0  ;;  %3955 = vst [vmem:[#allocation5_spill] sm:$0xff] %v3249_v1  ;;  %v3251_v16 = vpop.f32.mrf.mxu2 }
 0x13e   : > { %1276 = vadd.xlane.f32.xlu1 %v1275_v19  ;;  %1638 = vmatpush.bf16.msra.mxu3 %v1628_v11  ;;  %v2529_v11 = vor.u32 %v2620_v7, %v2526_v9 }
 0x140   : > { %1689 = vmatpush.bf16.msra.mxu2 %v2529_v11 }
 0x142   : > { %v911_v22 = vpop.f32.mrf.mxu0 }
 0x143   : > { %2471 = vmatmul.msk.f32.gmra.mxu1 %vm948_vm5, %v911_v22  ;;  %v1250_v24 = vmul.f32 %v911_v22, %v911_v22  ;;  %2546 = vmatmul.msk.bf16.vlgmr.msra.gmra.mxu2 %vm1062_vm1, %v3229_v47 }
 0x145   : > { %v1278_v17 = vsel %vm948_vm5, %v1250_v24, 0.0  ;;  %v3260_v24 = vpop.xlane.xlu2 %1193  ;;  %v3264_v29 = vpop.f32.mrf.mxu2 }
 0x146   : > { %1279 = vadd.xlane.f32.xlu2 %v1278_v17 }
 0x14a   : > { %v914_v63 = vpop.f32.mrf.mxu0 }
 0x14b   : > { %2472 = vmatmul.msk.f32.gmra.mxu1 %vm948_vm5, %v914_v63  ;;  %v3225_v43 = vpack.c.bf16 %v914_v63, %v911_v22  ;;  %v1251_v44 = vmul.f32 %v914_v63, %v914_v63  ;;  %v3258_v22 = vpop.xlane.xlu0 %1184 }
 0x14d   : > { %2509 = vmatmul.msk.bf16.gmra.mxu3 %vm948_vm5, %v3225_v43  ;;  %v1281_v48 = vsel %vm948_vm5, %v1251_v44, 0.0  ;;  %v3273_v63 = vpop.xlane.xlu2 %1202  ;;  %v3277_v44 = vpack.c.bf16 %v2831_v10, %v2834_v13 }
 0x14e   : > { %1282 = vadd.xlane.f32.xlu0 %v1281_v48 }
 0x14f   : > { %3956 = vst [vmem:[#allocation6_spill] sm:$0xff] %v3277_v44 }
 0x152   : > { %v917_v50 = vpop.f32.mrf.mxu0 }
 0x153   : > { %2473 = vmatmul.msk.f32.gmra.mxu1 %vm948_vm5, %v917_v50  ;;  %v1252_v57 = vmul.f32 %v917_v50, %v917_v50  ;;  %2547 = vmatmul.msk.bf16.gmra.mxu2 %vm1062_vm1, %v3249_v1  ;;  %v3268_v17 = vpop.xlane.xlu0 %1196 }
 0x155   : > { %v1284_v3 = vsel %vm948_vm5, %v1252_v57, 0.0  ;;  %v3286_v57 = vpop.xlane.xlu1 %1199  ;;  %v3292_v13 = vpop.xlane.xlu2 %1211 }
 0x156   : > { %1285 = vadd.xlane.f32.xlu1 %v1284_v3 }
 0x15a   : > { %v920_v59 = vpop.f32.mrf.mxu0 }
 0x15b   : > { %v3244_v60 = vpack.c.bf16 %v920_v59, %v917_v50  ;;  %2474 = vmatmul.msk.f32.gmra.mxu1 %vm948_vm5, %v920_v59  ;;  %v1253_v0 = vmul.f32 %v920_v59, %v920_v59  ;;  %v3284_v50 = vpop.f32.mrf.mxu2 }
 0x15d   : > { %2510 = vmatmul.msk.bf16.gmra.mxu3 %vm948_vm5, %v3244_v60  ;;  %v1287_v19 = vsel %vm948_vm5, %v1253_v0, 0.0  ;;  %v3289_v0 = vpop.xlane.xlu0 %1205 }
 0x15e   : > { %1288 = vadd.xlane.f32.xlu2 %v1287_v19 }
 0x162   : > { %v923_v25 = vpop.f32.mrf.mxu0 }
 0x163   : > { %2475 = vmatmul.msk.f32.gmra.mxu1 %vm948_vm5, %v923_v25  ;;  %v1254_v2 = vmul.f32 %v923_v25, %v923_v25  ;;  %2548 = vmatmul.msk.bf16.gmra.mxu2 %vm1062_vm1, %v3277_v44 }
 0x165   : > { %v1290_v5 = vsel %vm948_vm5, %v1254_v2, 0.0 }
 0x166   : > { %1291 = vadd.xlane.f32.xlu0 %v1290_v5 }
 0x16a   : > { %v926_v7 = vpop.f32.mrf.mxu0 }
 0x16b   : > { %v3270_v9 = vpack.c.bf16 %v926_v7, %v923_v25  ;;  %2476 = vmatmul.msk.f32.gmra.mxu1 %vm948_vm5, %v926_v7  ;;  %v1255_v11 = vmul.f32 %v926_v7, %v926_v7  ;;  %v3294_v25 = vpop.f32.mrf.mxu2  ;;  %v3299_v7 = vpop.xlane.xlu1 %1208 }
 0x16d   : > { %2511 = vmatmul.msk.bf16.gmra.mxu3 %vm948_vm5, %v3270_v9  ;;  %v1293_v48 = vsel %vm948_vm5, %v1255_v11, 0.0  ;;  %v3303_v11 = vpack.c.bf16 %v2851_v23, %v2841_v18 }
 0x16e   : > { %1294 = vadd.xlane.f32.xlu1 %v1293_v48 }
 0x16f   : > { %3957 = vst [vmem:[#allocation7_spill] sm:$0xff] %v3303_v11 }
 0x172   : > { %v929_v3 = vpop.f32.mrf.mxu0 }
 0x173   : > { %2477 = vmatmul.msk.f32.gmra.mxu1 %vm948_vm5, %v929_v3  ;;  %v1256_v59 = vmul.f32 %v929_v3, %v929_v3  ;;  %2549 = vmatmul.msk.bf16.gmra.mxu2 %vm1062_vm1, %v3303_v11  ;;  %v3315_v44 = vpop.f32.mrf.mxu2  ;;  %v3318_v23 = vpop.xlane.xlu1 %1217 }
 0x175   : > { %v1296_v10 = vsel %vm948_vm5, %v1256_v59, 0.0  ;;  %v3308_v59 = vpop.xlane.xlu0 %1214 }
 0x176   : > { %1297 = vadd.xlane.f32.xlu2 %v1296_v10 }
 0x17a   : > { %v932_v19 = vpop.f32.mrf.mxu0 }
 0x17b   : > { %v3296_v2 = vpack.c.bf16 %v932_v19, %v929_v3  ;;  %2478 = vmatmul.msk.f32.gmra.mxu1 %vm948_vm5, %v932_v19  ;;  %v1257_v5 = vmul.f32 %v932_v19, %v932_v19  ;;  %v3312_v3 = vpop.xlane.xlu2 %1220 }
 0x17c   : > { %3958 = vst [vmem:[#allocation8_spill] sm:$0xff] %v3312_v3 }
 0x17d   : > { %2512 = vmatmul.msk.bf16.gmra.mxu3 %vm948_vm5, %v3296_v2  ;;  %v1299_v48 = vsel %vm948_vm5, %v1257_v5, 0.0  ;;  %v1228_v5 = vsub.f32 %v3234_v49, %v3017_v61  ;;  %v3322_v58 = vpop.xlane.xlu0 %1223  ;;  %v1229_v49 = vsub.f32 %v3258_v22, %v3043_v28  ;;  %v1230_v28 = vsub.f32 %v3266_v31, %v3056_v38 }
 0x17e   : > { %1300 = vadd.xlane.f32.xlu0 %v1299_v48  ;;  %v3365_v38 = vpack.c.bf16 %v2866_v30, %v2869_v32 }
 0x182   : > { %v935_v10 = vpop.f32.mrf.mxu0 }
 0x183   : > { %2479 = vmatmul.msk.f32.gmra.mxu1 %vm948_vm5, %v935_v10  ;;  %v1258_v19 = vmul.f32 %v935_v10, %v935_v10 }
 0x185   : > { %v1302_v18 = vsel %vm948_vm5, %v1258_v19, 0.0  ;;  %v3331_v19 = vpack.c.bf16 %v2859_v27, %v2848_v21 }
 0x186   : > { %1303 = vadd.xlane.f32.xlu1 %v1302_v18 }
 0x187   : > { %3959 = vst [vmem:[#allocation9_spill] sm:$0xff] %v3331_v19  ;;  %2550 = vmatmul.msk.bf16.gmra.mxu2 %vm1062_vm1, %v3331_v19 }
 0x189   : > { %v1262_v11 = vpop.xlane.xlu2 %1261 }
 0x18a   : > { %v3324_v48 = vadd.f32 %v1262_v11, %v1228_v5  ;;  %v938_v1 = vpop.f32.mrf.mxu0  ;;  %v3340_v11 = vpop.f32.mrf.mxu2 }
 0x18b   : > { %v3326_v37 = vpack.c.bf16 %v938_v1, %v935_v10  ;;  %2480 = vmatmul.msk.f32.gmra.mxu1 %vm948_vm5, %v938_v1  ;;  %v1259_v3 = vmul.f32 %v938_v1, %v938_v1  ;;  %v3342_v10 = vpop.xlane.xlu1 %1226 }
 0x18d   : > { %2513 = vmatmul.msk.bf16.gmra.mxu3 %vm948_vm5, %v3326_v37  ;;  %v1305_v61 = vsel %vm948_vm5, %v1259_v3, 0.0 }
 0x18e   : > { %1306 = vadd.xlane.f32.xlu2 %v1305_v61 }
 0x190   : > { %v1014_v1 = vpop.f32.mrf.mxu1 }
 0x191   : > { %v1117_v21 = vadd.f32 %v3181_v46, %v1014_v1  ;;  %v1265_v27 = vpop.xlane.xlu0 %1264 }
 0x192   : > { %v3345_v18 = vadd.f32 %v1265_v27, %v1229_v49  ;;  %v3352_v61 = vpop.f32.mrf.mxu2 }
 0x193   : > { %v1324_v5 = vmul.f32 %v1117_v21, %v1117_v21  ;;  %2514 = vmatmul.msk.bf16.vlgmr.msrb.gmra.mxu1 %vm948_vm5, %v3169_v33  ;;  %v2532_v21 = vld [vmem:[%s3934_s6 + $0x10] sm:$0xf]  ;;  %v2623_v33 = vld [vmem:[%s3934_s6 + $0x14] sm:$0xf0] }
 0x194   : > { %v2533_v31 = vor.u32 %v2623_v33, %v2532_v21  ;;  %v3389_v21 = vpack.c.bf16 %v2887_v41, %v2877_v36 }
 0x195   : > { %v1341_v3 = vsel %vm1340_vm3, %v1324_v5, 0.0 }
 0x196   : > { %1342 = vadd.xlane.f32.xlu0 %v1341_v3  ;;  %1639 = vmatpush.bf16.msra.mxu3 %v2533_v31 }
 0x197   : > { %2551 = vmatmul.msk.bf16.gmra.mxu2 %vm1062_vm1, %v3365_v38 }
 0x198   : > { %v1017_v22 = vpop.f32.mrf.mxu1 }
 0x199   : > { %v1120_v19 = vadd.f32 %v3185_v51, %v1017_v22  ;;  %v1268_v46 = vpop.xlane.xlu1 %1267  ;;  %v1232_v22 = vsub.f32 %v3260_v24, %v3039_v26  ;;  %v1233_v26 = vsub.f32 %v3268_v17, %v3064_v42 }
 0x19a   : > { %v3355_v1 = vadd.f32 %v1268_v46, %v1230_v28  ;;  %v3377_v32 = vpop.f32.mrf.mxu2 }
 0x19b   : > { %v1325_v49 = vmul.f32 %v1120_v19, %v1120_v19  ;;  %v1231_v19 = vsub.f32 %v3242_v4, %v3028_v15 }
 0x19d   : > { %2517 = vmatmul.msk.bf16.vlgmr.msrb.gmra.mxu3 %vm948_vm5, %v3225_v43  ;;  %v1344_v51 = vsel %vm1340_vm3, %v1325_v49, 0.0 }
 0x19e   : > { %1345 = vadd.xlane.f32.xlu1 %v1344_v51  ;;  %v2621_v51 = vld [vmem:[%s3934_s6 + $0x4] sm:$0xf0] }
 0x1a0   : > { %v1020_v27 = vpop.f32.mrf.mxu1 }
 0x1a1   : > { %v1123_v5 = vadd.f32 %v3194_v62, %v1020_v27  ;;  %v1271_v3 = vpop.xlane.xlu2 %1270 }
 0x1a2   : > { %v3375_v30 = vadd.f32 %v1271_v3, %v1231_v19  ;;  %v3391_v33 = vpop.f32.mrf.mxu2 }
 0x1a3   : > { %v1326_v28 = vmul.f32 %v1123_v5, %v1123_v5  ;;  %2515 = vmatmul.msk.bf16.gmra.mxu1 %vm948_vm5, %v3188_v52 }
 0x1a5   : > { %v1347_v43 = vsel %vm1340_vm3, %v1326_v28, 0.0 }
 0x1a6   : > { %1348 = vadd.xlane.f32.xlu2 %v1347_v43  ;;  %v3421_v43 = vpack.c.bf16 %v2895_v45, %v2884_v39 }
 0x1a7   : > { %2552 = vmatmul.msk.bf16.gmra.mxu2 %vm1062_vm1, %v3389_v21 }
 0x1a8   : > { %v1023_v15 = vpop.f32.mrf.mxu1 }
 0x1a9   : > { %v1126_v4 = vadd.f32 %v3206_v20, %v1023_v15  ;;  %v1274_v46 = vpop.xlane.xlu0 %1273 }
 0x1aa   : > { %v3385_v62 = vadd.f32 %v1274_v46, %v1232_v22  ;;  %v3414_v19 = vpop.f32.mrf.mxu2 }
 0x1ab   : > { %v1327_v49 = vmul.f32 %v1126_v4, %v1126_v4 }
 0x1ad   : > { %2518 = vmatmul.msk.bf16.gmra.mxu3 %vm948_vm5, %v3244_v60  ;;  %v1350_v52 = vsel %vm1340_vm3, %v1327_v49, 0.0  ;;  %v2524_v60 = vld [vmem:[%s3934_s6] sm:$0xf]  ;;  %v1236_v49 = vsub.f32 %v3289_v0, %v3087_v55  ;;  %v1237_v55 = vsub.f32 %v3299_v7, %v3102_v6 }
 0x1ae   : > { %1351 = vadd.xlane.f32.xlu0 %v1350_v52  ;;  %v2525_v42 = vor.u32 %v2621_v51, %v2524_v60 }
 0x1b0   : > { %v1026_v20 = vpop.f32.mrf.mxu1  ;;  %1640 = vmatpush.bf16.msra.mxu3 %v2525_v42 }
 0x1b1   : > { %v1129_v24 = vadd.f32 %v3222_v34, %v1026_v20  ;;  %v1277_v31 = vpop.xlane.xlu1 %1276  ;;  %v1234_v34 = vsub.f32 %v3286_v57, %v3079_v53  ;;  %v1235_v57 = vsub.f32 %v3273_v63, %v3060_v40 }
 0x1b2   : > { %v3401_v36 = vadd.f32 %v1277_v31, %v1233_v26  ;;  %v3432_v15 = vpop.f32.mrf.mxu2 }
 0x1b3   : > { %v1328_v41 = vmul.f32 %v1129_v24, %v1129_v24  ;;  %2516 = vmatmul.msk.bf16.gmra.mxu1 %vm948_vm5, %v3198_v14 }
 0x1b5   : > { %v1353_v17 = vsel %vm1340_vm3, %v1328_v41, 0.0 }
 0x1b6   : > { %1354 = vadd.xlane.f32.xlu1 %v1353_v17 }
 0x1b7   : > { %2553 = vmatmul.msk.bf16.gmra.mxu2 %vm1062_vm1, %v3421_v43 }
 0x1b8   : > { %v1029_v27 = vpop.f32.mrf.mxu1 }
 0x1b9   : > { %v1132_v14 = vadd.f32 %v3238_v56, %v1029_v27  ;;  %v1280_v5 = vpop.xlane.xlu2 %1279 }
 0x1ba   : > { %v3417_v3 = vadd.f32 %v1280_v5, %v1234_v34  ;;  %v3445_v24 = vpop.f32.mrf.mxu2 }
 0x1bb   : > { %v1329_v28 = vmul.f32 %v1132_v14, %v1132_v14 }
 0x1bd   : > { %2519 = vmatmul.msk.bf16.gmra.mxu3 %vm948_vm5, %v3270_v9  ;;  %v1356_v53 = vsel %vm1340_vm3, %v1329_v28, 0.0 }
 0x1be   : > { %1357 = vadd.xlane.f32.xlu2 %v1356_v53  ;;  %v1239_v53 = vsub.f32 %v3308_v59, %v3110_v12  ;;  %v2633_v12 = vld [vmem:[%s3938_s10 + $0x38] sm:$0xff] }
 0x1bf   : > { %1983 = vmatpush.bf16.msrb.mxu0 %v2633_v12 }
 0x1c0   : > { %v1032_v56 = vpop.f32.mrf.mxu1  ;;  %v3430_v22 = vpop.f32.mrf.mxu3 }
 0x1c1   : > { %v1135_v39 = vadd.f32 %v3251_v16, %v1032_v56  ;;  %v1283_v45 = vpop.xlane.xlu0 %1282 }
 0x1c2   : > { %v3435_v4 = vadd.f32 %v1283_v45, %v1235_v57  ;;  %v3457_v17 = vpop.f32.mrf.mxu2 }
 0x1c3   : > { %v1330_v9 = vmul.f32 %v1135_v39, %v1135_v39 }
 0x1c5   : > { %v1359_v46 = vsel %vm1340_vm3, %v1330_v9, 0.0  ;;  %v1240_v9 = vsub.f32 %v3318_v23, %v3132_v35  ;;  %v2639_v35 = vld [vmem:[%s3938_s10 + $0x68] sm:$0xff] }
 0x1c6   : > { %1360 = vadd.xlane.f32.xlu0 %v1359_v46 }
 0x1c8   : > { %v1035_v52 = vpop.f32.mrf.mxu1  ;;  %v3440_v40 = vpop.f32.mrf.mxu3 }
 0x1c9   : > { %v1138_v63 = vadd.f32 %v3264_v29, %v1035_v52  ;;  %v1286_v26 = vpop.xlane.xlu1 %1285 }
 0x1ca   : > { %v3443_v20 = vadd.f32 %v1286_v26, %v1236_v49 }
 0x1cb   : > { %v1331_v16 = vmul.f32 %v1138_v63, %v1138_v63 }
 0x1cd   : > { %2520 = vmatmul.msk.bf16.gmra.mxu3 %vm948_vm5, %v3296_v2  ;;  %v1362_v31 = vsel %vm1340_vm3, %v1331_v16, 0.0  ;;  %v1238_v2 = vsub.f32 %v3292_v13, %v3083_v54  ;;  %v3472_v54 = vpop.f32.mrf.mxu2 }
 0x1ce   : > { %1363 = vadd.xlane.f32.xlu1 %v1362_v31 }
 0x1d0   : > { %v1038_v0 = vpop.f32.mrf.mxu1  ;;  %v3452_v41 = vpop.f32.mrf.mxu3 }
 0x1d1   : > { %v1141_v29 = vadd.f32 %v3284_v50, %v1038_v0  ;;  %v1289_v60 = vpop.xlane.xlu2 %1288 }
 0x1d2   : > { %v3455_v51 = vadd.f32 %v1289_v60, %v1237_v55  ;;  %v3962_v55 = vld [vmem:[#allocation8_spill] sm:$0xff] }
 0x1d3   : > { %v1332_v42 = vmul.f32 %v1141_v29, %v1141_v29  ;;  %v1241_v0 = vsub.f32 %v3962_v55, %v3106_v8 }
 0x1d4   : > { %3960 = vst [vmem:[#allocation10_spill] sm:$0xff] %v3455_v51 }
 0x1d5   : > { %v1365_v34 = vsel %vm1340_vm3, %v1332_v42, 0.0  ;;  %v3491_v46 = vpop.f32.mrf.mxu2 }
 0x1d6   : > { %1366 = vadd.xlane.f32.xlu2 %v1365_v34 }
 0x1d8   : > { %v1041_v27 = vpop.f32.mrf.mxu1  ;;  %v3462_v6 = vpop.f32.mrf.mxu3 }
 0x1d9   : > { %v1144_v7 = vadd.f32 %v3294_v25, %v1041_v27  ;;  %v1292_v14 = vpop.xlane.xlu0 %1291 }
 0x1da   : > { %v3465_v5 = vadd.f32 %v1292_v14, %v1238_v2  ;;  %v3964_v14 = vld [vmem:[#allocation3_spill] sm:$0xff] }
 0x1db   : > { %v1333_v50 = vmul.f32 %v1144_v7, %v1144_v7 }
 0x1dd   : > { %2521 = vmatmul.msk.bf16.gmra.mxu3 %vm948_vm5, %v3326_v37  ;;  %v1368_v28 = vsel %vm1340_vm3, %v1333_v50, 0.0  ;;  %v2641_v37 = vld [vmem:[%s3938_s10 + $0x78] sm:$0xff]  ;;  %v1693_v2 = vpop.f32.mrf.mxu2  ;;  %v1242_v50 = vsub.f32 %v3322_v58, %v3964_v14  ;;  %v2635_v58 = vld [vmem:[%s3938_s10 + $0x48] sm:$0xff] }
 0x1de   : > { %1369 = vadd.xlane.f32.xlu0 %v1368_v28  ;;  %2032 = vmatpush.bf16.msra.mxu1 %v2641_v37  ;;  %v2632_v28 = vld [vmem:[%s3938_s10 + $0x30] sm:$0xff] }
 0x1df   : > { %1984 = vmatpush.bf16.msrb.mxu0 %v2632_v28 }
 0x1e0   : > { %v1044_v13 = vpop.f32.mrf.mxu1  ;;  %v3474_v57 = vpop.f32.mrf.mxu3 }
 0x1e1   : > { %v1147_v25 = vadd.f32 %v3315_v44, %v1044_v13  ;;  %v1295_v56 = vpop.xlane.xlu1 %1294  ;;  %v2640_v44 = vld [vmem:[%s3938_s10 + $0x70] sm:$0xff] }
 0x1e2   : > { %v3477_v39 = vadd.f32 %v1295_v56, %v1239_v53  ;;  %2033 = vmatpush.bf16.msra.mxu1 %v2640_v44  ;;  %v3967_v44 = vld [vmem:[#allocation4_spill] sm:$0xff] }
 0x1e3   : > { %v1334_v45 = vmul.f32 %v1147_v25, %v1147_v25 }
 0x1e4   : > { %3961 = vst [vmem:[#allocation11_spill] sm:$0xff] %v3477_v39 }
 0x1e5   : > { %v1371_v59 = vsel %vm1340_vm3, %v1334_v45, 0.0  ;;  %v1696_v12 = vpop.f32.mrf.mxu2 }
 0x1e6   : > { %1372 = vadd.xlane.f32.xlu1 %v1371_v59  ;;  %2034 = vmatpush.bf16.msra.mxu1 %v2639_v35  ;;  %v3966_v59 = vld [vmem:[#allocation5_spill] sm:$0xff] }
 0x1e8   : > { %v1047_v49 = vpop.f32.mrf.mxu1  ;;  %v3493_v52 = vpop.f32.mrf.mxu3 }
 0x1e9   : > { %v1150_v63 = vadd.f32 %v3340_v11, %v1047_v49  ;;  %v1298_v26 = vpop.xlane.xlu2 %1297  ;;  %v2638_v11 = vld [vmem:[%s3938_s10 + $0x60] sm:$0xff]  ;;  %v1243_v49 = vsub.f32 %v3342_v10, %v3967_v44  ;;  %v2631_v10 = vld [vmem:[%s3938_s10 + $0x28] sm:$0xff] }
 0x1ea   : > { %v3496_v16 = vadd.f32 %v1298_v26, %v1240_v9  ;;  %2035 = vmatpush.bf16.msra.mxu1 %v2638_v11  ;;  %1985 = vmatpush.bf16.msrb.mxu0 %v2631_v10  ;;  %v2630_v44 = vld [vmem:[%s3938_s10 + $0x20] sm:$0xff] }
 0x1eb   : > { %v1335_v23 = vmul.f32 %v1150_v63, %v1150_v63 }
 0x1ed   : > { %2538 = vmatmul.msk.bf16.vlgmr.msra.gmra.mxu3 %vm1062_vm1, %v3229_v47  ;;  %v1374_v31 = vsel %vm1340_vm3, %v1335_v23, 0.0  ;;  %v2637_v47 = vld [vmem:[%s3938_s10 + $0x58] sm:$0xff]  ;;  %v1698_v11 = vpop.f32.mrf.mxu2 }
 0x1ee   : > { %1375 = vadd.xlane.f32.xlu2 %v1374_v31  ;;  %2036 = vmatpush.bf16.msra.mxu1 %v2637_v47 }
 0x1ef   : > { %1986 = vmatpush.bf16.msrb.mxu0 %v2630_v44 }
 0x1f0   : > { %v1050_v29 = vpop.f32.mrf.mxu1  ;;  %v3509_v60 = vpop.f32.mrf.mxu3 }
 0x1f1   : > { %v1153_v42 = vadd.f32 %v3352_v61, %v1050_v29  ;;  %v1301_v34 = vpop.xlane.xlu0 %1300  ;;  %v2636_v61 = vld [vmem:[%s3938_s10 + $0x50] sm:$0xff] }
 0x1f2   : > { %v3512_v27 = vadd.f32 %v1301_v34, %v1241_v0  ;;  %2037 = vmatpush.bf16.msra.mxu1 %v2636_v61 }
 0x1f3   : > { %v1336_v8 = vmul.f32 %v1153_v42, %v1153_v42 }
 0x1f4   : > { %3963 = vst [vmem:[#allocation8_spill] sm:$0xff] %v3512_v27 }
 0x1f5   : > { %v1377_v7 = vsel %vm1340_vm3, %v1336_v8, 0.0 }
 0x1f6   : > { %1378 = vadd.xlane.f32.xlu0 %v1377_v7  ;;  %2038 = vmatpush.bf16.msra.mxu1 %v2635_v58  ;;  %v3969_v7 = vld [vmem:[#allocation6_spill] sm:$0xff] }
 0x1f8   : > { %v1053_v53 = vpop.f32.mrf.mxu1  ;;  %v3526_v13 = vpop.f32.mrf.mxu3 }
 0x1f9   : > { %v1156_v25 = vadd.f32 %v3377_v32, %v1053_v53  ;;  %v1304_v56 = vpop.xlane.xlu1 %1303  ;;  %v2634_v32 = vld [vmem:[%s3938_s10 + $0x40] sm:$0xff] }
 0x1fa   : > { %v3529_v37 = vadd.f32 %v1304_v56, %v1242_v50  ;;  %2039 = vmatpush.bf16.msra.mxu1 %v2634_v32  ;;  %v1701_v50 = vpop.f32.mrf.mxu2 }
 0x1fb   : > { %v1337_v45 = vmul.f32 %v1156_v25, %v1156_v25 }
 0x1fc   : > { %3965 = vst [vmem:[#allocation3_spill] sm:$0xff] %v3529_v37 }
 0x1fd   : > { %2539 = vmatmul.msk.bf16.gmra.mxu3 %vm1062_vm1, %v3966_v59  ;;  %v1380_v9 = vsel %vm1340_vm3, %v1337_v45, 0.0  ;;  %v3579_v45 = vld [vmem:[%s3937_s9] sm:$0x3] }
 0x1fe   : > { %1381 = vadd.xlane.f32.xlu1 %v1380_v9  ;;  %v3583_v9 = vperm.slane %v3579_v45, 1 }
 0x200   : > { %v1056_v63 = vpop.f32.mrf.mxu1  ;;  %v3542_v26 = vpop.f32.mrf.mxu3 }
 0x201   : > { %v1159_v35 = vadd.f32 %v3391_v33, %v1056_v63  ;;  %v1307_v23 = vpop.xlane.xlu2 %1306 }
 0x202   : > { %v3545_v31 = vadd.f32 %v1307_v23, %v1243_v49  ;;  %v1703_v63 = vpop.f32.mrf.mxu2 }
 0x203   : > { %v1338_v55 = vmul.f32 %v1159_v35, %v1159_v35 }
 0x204   : > { %3968 = vst [vmem:[#allocation5_spill] sm:$0xff] %v3545_v31 }
 0x205   : > { %v1383_v0 = vsel %vm1340_vm3, %v1338_v55, 0.0 }
 0x206   : > { %1384 = vadd.xlane.f32.xlu2 %v1383_v0 }
 0x208   : > { %v1059_v29 = vpop.f32.mrf.mxu1  ;;  %v3551_v42 = vpop.f32.mrf.mxu3 }
 0x209   : > { %v1162_v34 = vadd.f32 %v3414_v19, %v1059_v29  ;;  %v3554_v47 = vpop.xlane.xlu0 %1342  ;;  %v3566_v19 = vld [vmem:[%s3936_s8] sm:$0x3] }
 0x20a   : > { %v3574_v58 = vperm.slane %v3566_v19, 1  ;;  %v3970_v29 = vld [vmem:[#allocation7_spill] sm:$0xff] }
 0x20b   : > { %v1339_v8 = vmul.f32 %v1162_v34, %v1162_v34 }
 0x20d   : > { %2540 = vmatmul.msk.bf16.gmra.mxu3 %vm1062_vm1, %v3969_v7  ;;  %v1386_v14 = vsel %vm1340_vm3, %v1339_v8, 0.0 }
 0x20e   : > { %1387 = vadd.xlane.f32.xlu0 %v1386_v14 }
 0x210   : > { %v3561_v61 = vpop.f32.mrf.mxu3  ;;  %v1536_v28 = vpop.f32.mrf.mxu1 }
 0x211   : > { %v3568_v53 = vpop.xlane.xlu1 %1345  ;;  %v1692_v56 = vadd.f32 %v3491_v46, %v1536_v28 }
 0x213   : > { %v1738_v59 = vmul.f32 %v3574_v58, %v1692_v56 }
 0x215   : > { %v1776_v55 = vadd.f32 %v3583_v9, %v1738_v59 }
 0x217   : > { %v1808_v34 = vmax.f32 %v1776_v55, 0.0 }
 0x218   : > { %v3588_v49 = vpop.f32.mrf.mxu3  ;;  %v1538_v46 = vpop.f32.mrf.mxu1 }
 0x219   : > { %v1694_v32 = vadd.f32 %v1693_v2, %v1538_v46  ;;  %v3590_v35 = vpop.xlane.xlu2 %1348  ;;  %v1706_v46 = vpop.f32.mrf.mxu2 }
 0x21b   : > { %v1740_v0 = vmul.f32 %v3574_v58, %v1694_v32  ;;  %v2629_v32 = vld [vmem:[%s3938_s10 + $0x18] sm:$0xff] }
 0x21c   : > { %1987 = vmatpush.bf16.msrb.mxu0 %v2629_v32 }
 0x21d   : > { %v1778_v10 = vadd.f32 %v3583_v9, %v1740_v0  ;;  %2541 = vmatmul.msk.bf16.gmra.mxu3 %vm1062_vm1, %v3970_v29 }
 0x21f   : > { %v1810_v8 = vmax.f32 %v1778_v10, 0.0 }
 0x220   : > { %v1541_v7 = vpop.f32.mrf.mxu1  ;;  %v1551_v2 = vpop.f32.mrf.mxu3 }
 0x221   : > { %v1840_v14 = vpack.c.bf16 %v1810_v8, %v1808_v34  ;;  %v3599_v28 = vpop.xlane.xlu0 %1351  ;;  %v1697_v44 = vadd.f32 %v1696_v12, %v1541_v7  ;;  %v1707_v27 = vadd.f32 %v1706_v46, %v1551_v2 }
 0x223   : > { %2040 = vmatmul.bf16.vlgmr.msra.gmra.mxu1 %v1840_v14  ;;  %v1742_v59 = vmul.f32 %v3574_v58, %v1697_v44  ;;  %v1708_v14 = vpop.f32.mrf.mxu2  ;;  %v3971_v44 = vld [vmem:[#allocation9_spill] sm:$0xff] }
 0x225   : > { %v1780_v8 = vadd.f32 %v3583_v9, %v1742_v59 }
 0x227   : > { %v1812_v23 = vmax.f32 %v1780_v8, 0.0 }
 0x228   : > { %v1543_v0 = vpop.f32.mrf.mxu1  ;;  %v1553_v55 = vpop.f32.mrf.mxu3 }
 0x229   : > { %v1699_v10 = vadd.f32 %v1698_v11, %v1543_v0  ;;  %v3607_v29 = vpop.xlane.xlu1 %1354  ;;  %v1709_v37 = vadd.f32 %v1708_v14, %v1553_v55 }
 0x22b   : > { %v1744_v12 = vmul.f32 %v3574_v58, %v1699_v10  ;;  %v1711_v10 = vpop.f32.mrf.mxu2 }
 0x22d   : > { %v1782_v7 = vadd.f32 %v3583_v9, %v1744_v12  ;;  %2542 = vmatmul.msk.bf16.gmra.mxu3 %vm1062_vm1, %v3971_v44  ;;  %v2628_v12 = vld [vmem:[%s3938_s10 + $0x10] sm:$0xff] }
 0x22e   : > { %1988 = vmatpush.bf16.msrb.mxu0 %v2628_v12 }
 0x22f   : > { %v1814_v56 = vmax.f32 %v1782_v7, 0.0 }
 0x230   : > { %v1546_v25 = vpop.f32.mrf.mxu1  ;;  %v1556_v11 = vpop.f32.mrf.mxu3 }
 0x231   : > { %v3616_v0 = vpop.xlane.xlu2 %1357  ;;  %v1842_v32 = vpack.c.bf16 %v1814_v56, %v1812_v23  ;;  %v1702_v33 = vadd.f32 %v1701_v50, %v1546_v25 }
 0x233   : > { %2045 = vmatmul.bf16.gmra.mxu1 %v1842_v32  ;;  %v1746_v59 = vmul.f32 %v3574_v58, %v1702_v33  ;;  %v1713_v12 = vpop.f32.mrf.mxu2 }
 0x235   : > { %v1784_v56 = vadd.f32 %v3583_v9, %v1746_v59  ;;  %v1752_v59 = vmul.f32 %v3574_v58, %v1709_v37 }
 0x237   : > { %v1816_v25 = vmax.f32 %v1784_v56, 0.0  ;;  %v1790_v55 = vadd.f32 %v3583_v9, %v1752_v59 }
 0x238   : > { %v1548_v44 = vpop.f32.mrf.mxu1  ;;  %v1558_v8 = vpop.f32.mrf.mxu3 }
 0x239   : > { %v1704_v7 = vadd.f32 %v1703_v63, %v1548_v44  ;;  %v3624_v31 = vpop.xlane.xlu0 %1360 }
 0x23b   : > { %v1748_v50 = vmul.f32 %v3574_v58, %v1704_v7  ;;  %v1750_v7 = vmul.f32 %v3574_v58, %v1707_v27  ;;  %v1716_v46 = vpop.f32.mrf.mxu2 }
 0x23d   : > { %v1786_v33 = vadd.f32 %v3583_v9, %v1748_v50  ;;  %2543 = vmatmul.msk.bf16.gmra.mxu3 %vm1062_vm1, %v3365_v38  ;;  %v2627_v38 = vld [vmem:[%s3938_s10 + $0x8] sm:$0xff]  ;;  %v1788_v2 = vadd.f32 %v3583_v9, %v1750_v7 }
 0x23e   : > { %1989 = vmatpush.bf16.msrb.mxu0 %v2627_v38  ;;  %v1712_v38 = vadd.f32 %v1711_v10, %v1556_v11 }
 0x23f   : > { %v1818_v32 = vmax.f32 %v1786_v33, 0.0  ;;  %v1822_v33 = vmax.f32 %v1790_v55, 0.0  ;;  %v1820_v27 = vmax.f32 %v1788_v2, 0.0 }
 0x240   : > { %v1561_v34 = vpop.f32.mrf.mxu3  ;;  %v1754_v7 = vmul.f32 %v3574_v58, %v1712_v38 }
 0x241   : > { %v3633_v63 = vpop.xlane.xlu1 %1363  ;;  %v1844_v44 = vpack.c.bf16 %v1818_v32, %v1816_v25  ;;  %v1714_v25 = vadd.f32 %v1713_v12, %v1558_v8 }
 0x242   : > { %v1792_v11 = vadd.f32 %v3583_v9, %v1754_v7 }
 0x243   : > { %2050 = vmatmul.bf16.gmra.mxu1 %v1844_v44  ;;  %v1846_v44 = vpack.c.bf16 %v1822_v33, %v1820_v27  ;;  %v1756_v50 = vmul.f32 %v3574_v58, %v1714_v25  ;;  %v1718_v23 = vpop.f32.mrf.mxu2 }
 0x244   : > { %v1824_v33 = vmax.f32 %v1792_v11, 0.0 }
 0x245   : > { %v1794_v8 = vadd.f32 %v3583_v9, %v1756_v50 }
 0x247   : > { %v1826_v10 = vmax.f32 %v1794_v8, 0.0 }
 0x248   : > { %v1563_v56 = vpop.f32.mrf.mxu3 }
 0x249   : > { %v3643_v14 = vpop.xlane.xlu2 %1366  ;;  %v1848_v59 = vpack.c.bf16 %v1826_v10, %v1824_v33 }
 0x24b   : > { %v1721_v27 = vpop.f32.mrf.mxu2 }
 0x24d   : > { %2544 = vmatmul.msk.bf16.gmra.mxu3 %vm1062_vm1, %v3389_v21  ;;  %v2626_v21 = vld [vmem:[%s3938_s10] sm:$0xff] }
 0x24e   : > { %1990 = vmatpush.bf16.msrb.mxu0 %v2626_v21  ;;  %v1717_v21 = vadd.f32 %v1716_v46, %v1561_v34 }
 0x250   : > { %v1566_v37 = vpop.f32.mrf.mxu3  ;;  %v1758_v7 = vmul.f32 %v3574_v58, %v1717_v21  ;;  %v3681_v21 = vperm.slane %v3566_v19, 0 }
 0x251   : > { %v3650_v32 = vpop.xlane.xlu0 %1369 }
 0x253   : > { %2055 = vmatmul.bf16.gmra.mxu1 %v1846_v44  ;;  %v1719_v44 = vadd.f32 %v1718_v23, %v1563_v56  ;;  %v1723_v11 = vpop.f32.mrf.mxu2  ;;  %v1796_v56 = vadd.f32 %v3583_v9, %v1758_v7 }
 0x255   : > { %v1760_v2 = vmul.f32 %v3574_v58, %v1719_v44  ;;  %v1828_v33 = vmax.f32 %v1796_v56, 0.0 }
 0x257   : > { %v1798_v51 = vadd.f32 %v3583_v9, %v1760_v2 }
 0x258   : > { %v1568_v55 = vpop.f32.mrf.mxu3 }
 0x259   : > { %v3660_v12 = vpop.xlane.xlu1 %1372  ;;  %v1830_v10 = vmax.f32 %v1798_v51, 0.0  ;;  %v1724_v34 = vadd.f32 %v1723_v11, %v1568_v55  ;;  %v3687_v51 = vperm.slane %v3579_v45, 0 }
 0x25b   : > { %v1850_v46 = vpack.c.bf16 %v1830_v10, %v1828_v33  ;;  %v1726_v2 = vpop.f32.mrf.mxu2  ;;  %v1764_v39 = vmul.f32 %v3574_v58, %v1724_v34 }
 0x25d   : > { %2545 = vmatmul.msk.bf16.gmra.mxu3 %vm1062_vm1, %v3421_v43  ;;  %v1802_v55 = vadd.f32 %v3583_v9, %v1764_v39  ;;  %vm2353_vm1 = vcmask 7168  }
 0x260   : > { %v1571_v25 = vpop.f32.mrf.mxu3 }
 0x261   : > { %v3667_v38 = vpop.xlane.xlu2 %1375  ;;  %v1727_v39 = vadd.f32 %v1726_v2, %v1571_v25 }
 0x262   : > { %3972 = vst [vmem:[#allocation4_spill] sm:$0xff] %v3667_v38 }
 0x263   : > { %2060 = vmatmul.bf16.gmra.mxu1 %v1848_v59  ;;  %v1722_v59 = vadd.f32 %v1721_v27, %v1566_v37  ;;  %v1728_v56 = vpop.f32.mrf.mxu2 }
 0x265   : > { %v1762_v38 = vmul.f32 %v3574_v58, %v1722_v59 }
 0x268   : > { %v1573_v8 = vpop.f32.mrf.mxu3 }
 0x269   : > { %v3674_v43 = vpop.xlane.xlu0 %1378 }
 0x270   : > { %v1642_v50 = vpop.f32.mrf.mxu3 }
 0x271   : > { %v1643_v44 = vadd.f32 %v1642_v50, %v3432_v15  ;;  %v1800_v15 = vadd.f32 %v3583_v9, %v1762_v38  ;;  %v1834_v50 = vmax.f32 %v1802_v55, 0.0 }
 0x273   : > { %2065 = vmatmul.bf16.gmra.mxu1 %v1850_v46  ;;  %v1737_v23 = vmul.f32 %v3681_v21, %v1643_v44  ;;  %v1832_v10 = vmax.f32 %v1800_v15, 0.0  ;;  %v1729_v46 = vadd.f32 %v1728_v56, %v1573_v8 }
 0x275   : > { %v1775_v19 = vadd.f32 %v3687_v51, %v1737_v23  ;;  %v1852_v44 = vpack.c.bf16 %v1834_v50, %v1832_v10  ;;  %v1768_v38 = vmul.f32 %v3574_v58, %v1729_v46  ;;  %v1766_v23 = vmul.f32 %v3574_v58, %v1727_v39 }
 0x277   : > { %v1807_v33 = vmax.f32 %v1775_v19, 0.0  ;;  %v1804_v8 = vadd.f32 %v3583_v9, %v1766_v23 }
 0x278   : > { %v1644_v7 = vpop.f32.mrf.mxu3 }
 0x279   : > { %v1645_v37 = vadd.f32 %v1644_v7, %v3445_v24 }
 0x27b   : > { %v1739_v27 = vmul.f32 %v3681_v21, %v1645_v37  ;;  %v1806_v37 = vadd.f32 %v3583_v9, %v1768_v38 }
 0x27d   : > { %v1777_v11 = vadd.f32 %v3687_v51, %v1739_v27  ;;  %v1836_v27 = vmax.f32 %v1804_v8, 0.0 }
 0x27f   : > { %v1809_v34 = vmax.f32 %v1777_v11, 0.0 }
 0x280   : > { %v1647_v45 = vpop.f32.mrf.mxu3 }
 0x281   : > { %v1839_v59 = vpack.c.bf16 %v1809_v34, %v1807_v33  ;;  %v1648_v24 = vadd.f32 %v1647_v45, %v3457_v17  ;;  %v1838_v17 = vmax.f32 %v1806_v37, 0.0 }
 0x283   : > { %1991 = vmatmul.bf16.vlgmr.msrb.gmra.mxu0 %v1839_v59  ;;  %2070 = vmatmul.bf16.gmra.mxu1 %v1852_v44  ;;  %v1741_v7 = vmul.f32 %v3681_v21, %v1648_v24  ;;  %v1854_v10 = vpack.c.bf16 %v1838_v17, %v1836_v27 }
 0x285   : > { %v1779_v25 = vadd.f32 %v3687_v51, %v1741_v7 }
 0x287   : > { %v1811_v50 = vmax.f32 %v1779_v25, 0.0 }
 0x288   : > { %v1649_v55 = vpop.f32.mrf.mxu3 }
 0x289   : > { %v1650_v15 = vadd.f32 %v1649_v55, %v3472_v54 }
 0x28b   : > { %v1743_v19 = vmul.f32 %v3681_v21, %v1650_v15 }
 0x28d   : > { %v1781_v2 = vadd.f32 %v3687_v51, %v1743_v19 }
 0x28f   : > { %v1813_v11 = vmax.f32 %v1781_v2, 0.0 }
 0x290   : > { %v1652_v58 = vpop.f32.mrf.mxu3 }
 0x291   : > { %v1841_v56 = vpack.c.bf16 %v1813_v11, %v1811_v50  ;;  %v1653_v33 = vadd.f32 %v1652_v58, %v3430_v22 }
 0x293   : > { %1996 = vmatmul.bf16.gmra.mxu0 %v1841_v56  ;;  %2075 = vmatmul.bf16.gmra.mxu1 %v1854_v10  ;;  %v1745_v54 = vmul.f32 %v3681_v21, %v1653_v33 }
 0x295   : > { %v1783_v46 = vadd.f32 %v3687_v51, %v1745_v54 }
 0x297   : > { %v1815_v44 = vmax.f32 %v1783_v46, 0.0 }
 0x298   : > { %v1654_v9 = vpop.f32.mrf.mxu3 }
 0x299   : > { %v1655_v34 = vadd.f32 %v1654_v9, %v3440_v40 }
 0x29b   : > { %v1747_v45 = vmul.f32 %v3681_v21, %v1655_v34 }
 0x29d   : > { %v1785_v59 = vadd.f32 %v3687_v51, %v1747_v45 }
 0x29f   : > { %v1817_v39 = vmax.f32 %v1785_v59, 0.0 }
 0x2a0   : > { %v1657_v24 = vpop.f32.mrf.mxu3 }
 0x2a1   : > { %v1843_v38 = vpack.c.bf16 %v1817_v39, %v1815_v44  ;;  %v1658_v23 = vadd.f32 %v1657_v24, %v3452_v41 }
 0x2a3   : > { %2001 = vmatmul.bf16.gmra.mxu0 %v1843_v38  ;;  %v1749_v22 = vmul.f32 %v3681_v21, %v1658_v23 }
 0x2a5   : > { %v1787_v37 = vadd.f32 %v3687_v51, %v1749_v22 }
 0x2a7   : > { %v1819_v8 = vmax.f32 %v1787_v37, 0.0 }
 0x2a8   : > { %v1659_v7 = vpop.f32.mrf.mxu3 }
 0x2a9   : > { %v1660_v55 = vadd.f32 %v1659_v7, %v3462_v6 }
 0x2ab   : > { %v1751_v40 = vmul.f32 %v3681_v21, %v1660_v55 }
 0x2ad   : > { %v1789_v15 = vadd.f32 %v3687_v51, %v1751_v40 }
 0x2af   : > { %v1821_v19 = vmax.f32 %v1789_v15, 0.0 }
 0x2b0   : > { %v1662_v25 = vpop.f32.mrf.mxu3 }
 0x2b1   : > { %v1845_v17 = vpack.c.bf16 %v1821_v19, %v1819_v8  ;;  %v1663_v2 = vadd.f32 %v1662_v25, %v3474_v57  ;;  %v2041_v25 = vpop.f32.mrf.mxu1 }
 0x2b3   : > { %2006 = vmatmul.bf16.gmra.mxu0 %v1845_v17  ;;  %v1753_v41 = vmul.f32 %v3681_v21, %v1663_v2 }
 0x2b5   : > { %v1791_v6 = vadd.f32 %v3687_v51, %v1753_v41 }
 0x2b7   : > { %v1823_v56 = vmax.f32 %v1791_v6, 0.0 }
 0x2b8   : > { %v1664_v27 = vpop.f32.mrf.mxu3 }
 0x2b9   : > { %v1665_v50 = vadd.f32 %v1664_v27, %v3493_v52 }
 0x2bb   : > { %v1755_v11 = vmul.f32 %v3681_v21, %v1665_v50  ;;  %v2043_v50 = vpop.f32.mrf.mxu1 }
 0x2bd   : > { %v1793_v58 = vadd.f32 %v3687_v51, %v1755_v11 }
 0x2bf   : > { %v1825_v10 = vmax.f32 %v1793_v58, 0.0 }
 0x2c0   : > { %v1667_v33 = vpop.f32.mrf.mxu3 }
 0x2c1   : > { %v1847_v54 = vpack.c.bf16 %v1825_v10, %v1823_v56  ;;  %v1668_v9 = vadd.f32 %v1667_v33, %v3509_v60 }
 0x2c3   : > { %2011 = vmatmul.bf16.gmra.mxu0 %v1847_v54  ;;  %v1757_v57 = vmul.f32 %v3681_v21, %v1668_v9  ;;  %v2046_v10 = vpop.f32.mrf.mxu1 }
 0x2c5   : > { %v1795_v52 = vadd.f32 %v3687_v51, %v1757_v57  ;;  %v3756_v57 = vld [vmem:[%s3941_s13] ss:$0 sm:$0xff] }
 0x2c7   : > { %v1827_v44 = vmax.f32 %v1795_v52, 0.0 }
 0x2c8   : > { %v1669_v34 = vpop.f32.mrf.mxu3 }
 0x2c9   : > { %v1670_v45 = vadd.f32 %v1669_v34, %v3526_v13 }
 0x2cb   : > { %v1759_v46 = vmul.f32 %v3681_v21, %v1670_v45  ;;  %v2048_v33 = vpop.f32.mrf.mxu1 }
 0x2cd   : > { %v1797_v59 = vadd.f32 %v3687_v51, %v1759_v46 }
 0x2cf   : > { %v1829_v39 = vmax.f32 %v1797_v59, 0.0 }
 0x2d0   : > { %v1672_v24 = vpop.f32.mrf.mxu3 }
 0x2d1   : > { %v1849_v38 = vpack.c.bf16 %v1829_v39, %v1827_v44  ;;  %v1673_v23 = vadd.f32 %v1672_v24, %v3542_v26 }
 0x2d3   : > { %2016 = vmatmul.bf16.gmra.mxu0 %v1849_v38  ;;  %v1761_v60 = vmul.f32 %v3681_v21, %v1673_v23  ;;  %v2051_v59 = vpop.f32.mrf.mxu1 }
 0x2d5   : > { %v1799_v13 = vadd.f32 %v3687_v51, %v1761_v60 }
 0x2d7   : > { %v1831_v37 = vmax.f32 %v1799_v13, 0.0 }
 0x2d8   : > { %v1674_v22 = vpop.f32.mrf.mxu3 }
 0x2d9   : > { %v1675_v7 = vadd.f32 %v1674_v22, %v3551_v42 }
 0x2db   : > { %v1763_v55 = vmul.f32 %v3681_v21, %v1675_v7  ;;  %v2053_v7 = vpop.f32.mrf.mxu1 }
 0x2dd   : > { %v1801_v40 = vadd.f32 %v3687_v51, %v1763_v55 }
 0x2df   : > { %v1833_v15 = vmax.f32 %v1801_v40, 0.0 }
 0x2e0   : > { %v1677_v8 = vpop.f32.mrf.mxu3 }
 0x2e1   : > { %v1851_v19 = vpack.c.bf16 %v1833_v15, %v1831_v37  ;;  %v1678_v17 = vadd.f32 %v1677_v8, %v3561_v61  ;;  %v3744_v61 = vld [vmem:[%s3939_s11] ss:$0 sm:$0xff] }
 0x2e3   : > { %2021 = vmatmul.bf16.gmra.mxu0 %v1851_v19  ;;  %v1765_v26 = vmul.f32 %v3681_v21, %v1678_v17 }
 0x2e5   : > { %v1803_v42 = vadd.f32 %v3687_v51, %v1765_v26 }
 0x2e7   : > { %v1835_v11 = vmax.f32 %v1803_v42, 0.0 }
 0x2e8   : > { %v1679_v2 = vpop.f32.mrf.mxu3 }
 0x2e9   : > { %v1680_v41 = vadd.f32 %v1679_v2, %v3588_v49 }
 0x2eb   : > { %v1767_v27 = vmul.f32 %v3681_v21, %v1680_v41  ;;  %v3749_v21 = vld [vmem:[%s3940_s12] ss:$0 sm:$0xff] }
 0x2ed   : > { %v1805_v6 = vadd.f32 %v3687_v51, %v1767_v27 }
 0x2ef   : > { %v1837_v58 = vmax.f32 %v1805_v6, 0.0 }
 0x2f1   : > { %v1853_v56 = vpack.c.bf16 %v1837_v58, %v1835_v11 }
 0x2f3   : > { %2026 = vmatmul.bf16.gmra.mxu0 %v1853_v56 }
 0x300   : > { %v1992_v54 = vpop.f32.mrf.mxu0 }
 0x301   : > { %v2042_v49 = vadd.f32 %v2041_v25, %v1992_v54  ;;  %v2056_v25 = vpop.f32.mrf.mxu1 }
 0x303   : > { %v2085_v51 = vmul.f32 %v3744_v61, %v2042_v49 }
 0x305   : > { %v2105_v9 = vadd.f32 %v3749_v21, %v2085_v51 }
 0x307   : > { %v2121_v34 = vmax.f32 %v2105_v9, 0.0 }
 0x308   : > { %v1994_v45 = vpop.f32.mrf.mxu0 }
 0x309   : > { %v2044_v52 = vadd.f32 %v2043_v50, %v1994_v45  ;;  %v2141_v46 = vmul.f32 %v3756_v57, %v2121_v34  ;;  %v2058_v6 = vpop.f32.mrf.mxu1 }
 0x30b   : > { %v2086_v44 = vmul.f32 %v3744_v61, %v2044_v52  ;;  %2157 = vadd.xlane.f32.xlu1 %v2141_v46 }
 0x30d   : > { %v2106_v39 = vadd.f32 %v3749_v21, %v2086_v44 }
 0x30f   : > { %v2122_v24 = vmax.f32 %v2106_v39, 0.0 }
 0x310   : > { %v1997_v38 = vpop.f32.mrf.mxu0 }
 0x311   : > { %v2047_v23 = vadd.f32 %v2046_v10, %v1997_v38  ;;  %v2142_v60 = vmul.f32 %v3756_v57, %v2122_v24  ;;  %v2061_v34 = vpop.f32.mrf.mxu1 }
 0x313   : > { %v2087_v22 = vmul.f32 %v3744_v61, %v2047_v23  ;;  %2159 = vadd.xlane.f32.xlu2 %v2142_v60 }
 0x315   : > { %v2107_v13 = vadd.f32 %v3749_v21, %v2087_v22 }
 0x317   : > { %v2123_v55 = vmax.f32 %v2107_v13, 0.0 }
 0x318   : > { %v1999_v40 = vpop.f32.mrf.mxu0 }
 0x319   : > { %v2049_v37 = vadd.f32 %v2048_v33, %v1999_v40  ;;  %v2143_v15 = vmul.f32 %v3756_v57, %v2123_v55  ;;  %v2063_v38 = vpop.f32.mrf.mxu1 }
 0x31b   : > { %v2088_v8 = vmul.f32 %v3744_v61, %v2049_v37  ;;  %2161 = vadd.xlane.f32.xlu0 %v2143_v15 }
 0x31d   : > { %v2108_v19 = vadd.f32 %v3749_v21, %v2088_v8 }
 0x31f   : > { %v2124_v17 = vmax.f32 %v2108_v19, 0.0 }
 0x320   : > { %v2002_v26 = vpop.f32.mrf.mxu0 }
 0x321   : > { %v2052_v2 = vadd.f32 %v2051_v59, %v2002_v26  ;;  %v2144_v41 = vmul.f32 %v3756_v57, %v2124_v17  ;;  %v2066_v37 = vpop.f32.mrf.mxu1 }
 0x323   : > { %v2089_v42 = vmul.f32 %v3744_v61, %v2052_v2  ;;  %2163 = vadd.xlane.f32.xlu1 %v2144_v41 }
 0x325   : > { %v2109_v27 = vadd.f32 %v3749_v21, %v2089_v42 }
 0x327   : > { %v2125_v50 = vmax.f32 %v2109_v27, 0.0 }
 0x328   : > { %v2004_v11 = vpop.f32.mrf.mxu0 }
 0x329   : > { %v2054_v58 = vadd.f32 %v2053_v7, %v2004_v11  ;;  %v2145_v56 = vmul.f32 %v3756_v57, %v2125_v50  ;;  %v2068_v41 = vpop.f32.mrf.mxu1 }
 0x32b   : > { %v2090_v10 = vmul.f32 %v3744_v61, %v2054_v58  ;;  %2165 = vadd.xlane.f32.xlu2 %v2145_v56 }
 0x32d   : > { %v2110_v33 = vadd.f32 %v3749_v21, %v2090_v10 }
 0x32f   : > { %v2126_v54 = vmax.f32 %v2110_v33, 0.0 }
 0x330   : > { %v2007_v49 = vpop.f32.mrf.mxu0 }
 0x331   : > { %v2057_v51 = vadd.f32 %v2056_v25, %v2007_v49  ;;  %v2146_v9 = vmul.f32 %v3756_v57, %v2126_v54  ;;  %v2071_v54 = vpop.f32.mrf.mxu1 }
 0x333   : > { %v2091_v45 = vmul.f32 %v3744_v61, %v2057_v51  ;;  %2167 = vadd.xlane.f32.xlu0 %v2146_v9 }
 0x335   : > { %v2111_v52 = vadd.f32 %v3749_v21, %v2091_v45 }
 0x337   : > { %v2127_v46 = vmax.f32 %v2111_v52, 0.0 }
 0x338   : > { %v2009_v59 = vpop.f32.mrf.mxu0 }
 0x339   : > { %v2059_v44 = vadd.f32 %v2058_v6, %v2009_v59  ;;  %v2147_v39 = vmul.f32 %v3756_v57, %v2127_v46  ;;  %v2073_v59 = vpop.f32.mrf.mxu1 }
 0x33b   : > { %v2092_v24 = vmul.f32 %v3744_v61, %v2059_v44  ;;  %2169 = vadd.xlane.f32.xlu1 %v2147_v39 }
 0x33d   : > { %v2112_v23 = vadd.f32 %v3749_v21, %v2092_v24 }
 0x33f   : > { %v2128_v60 = vmax.f32 %v2112_v23, 0.0 }
 0x340   : > { %v2012_v22 = vpop.f32.mrf.mxu0 }
 0x341   : > { %v2062_v7 = vadd.f32 %v2061_v34, %v2012_v22  ;;  %v2148_v13 = vmul.f32 %v3756_v57, %v2128_v60 }
 0x343   : > { %v2093_v55 = vmul.f32 %v3744_v61, %v2062_v7  ;;  %2171 = vadd.xlane.f32.xlu2 %v2148_v13  ;;  %v2076_v7 = vpop.f32.mrf.mxu1 }
 0x345   : > { %v2113_v40 = vadd.f32 %v3749_v21, %v2093_v55 }
 0x347   : > { %v2129_v15 = vmax.f32 %v2113_v40, 0.0 }
 0x348   : > { %v2014_v8 = vpop.f32.mrf.mxu0 }
 0x349   : > { %v2064_v19 = vadd.f32 %v2063_v38, %v2014_v8  ;;  %v2149_v25 = vmul.f32 %v3756_v57, %v2129_v15 }
 0x34b   : > { %v2094_v17 = vmul.f32 %v3744_v61, %v2064_v19  ;;  %2173 = vadd.xlane.f32.xlu0 %v2149_v25  ;;  %v2078_v25 = vpop.f32.mrf.mxu1 }
 0x34d   : > { %v2114_v26 = vadd.f32 %v3749_v21, %v2094_v17 }
 0x34f   : > { %v2130_v2 = vmax.f32 %v2114_v26, 0.0 }
 0x350   : > { %v2017_v42 = vpop.f32.mrf.mxu0 }
 0x351   : > { %v2067_v27 = vadd.f32 %v2066_v37, %v2017_v42  ;;  %v2150_v50 = vmul.f32 %v3756_v57, %v2130_v2 }
 0x353   : > { %v2095_v6 = vmul.f32 %v3744_v61, %v2067_v27  ;;  %2175 = vadd.xlane.f32.xlu1 %v2150_v50  ;;  %v3803_v27 = vpop.xlane.xlu1 %1381 }
 0x355   : > { %v2115_v11 = vadd.f32 %v3749_v21, %v2095_v6 }
 0x357   : > { %v2131_v58 = vmax.f32 %v2115_v11, 0.0  ;;  %v3806_v11 = vpop.xlane.xlu2 %1384 }
 0x358   : > { %v2019_v56 = vpop.f32.mrf.mxu0 }
 0x359   : > { %v2069_v10 = vadd.f32 %v2068_v41, %v2019_v56  ;;  %v2151_v33 = vmul.f32 %v3756_v57, %v2131_v58  ;;  %v2663_v58 = vld [vmem:[#allocation2] ss:$0 sm:$0xff] }
 0x35b   : > { %v2096_v49 = vmul.f32 %v3744_v61, %v2069_v10  ;;  %2177 = vadd.xlane.f32.xlu2 %v2151_v33 }
 0x35d   : > { %v2116_v51 = vadd.f32 %v3749_v21, %v2096_v49 }
 0x35f   : > { %v2132_v9 = vmax.f32 %v2116_v51, 0.0 }
 0x360   : > { %v2022_v34 = vpop.f32.mrf.mxu0 }
 0x361   : > { %v2072_v45 = vadd.f32 %v2071_v54, %v2022_v34  ;;  %v2152_v52 = vmul.f32 %v3756_v57, %v2132_v9 }
 0x363   : > { %v2097_v46 = vmul.f32 %v3744_v61, %v2072_v45  ;;  %2179 = vadd.xlane.f32.xlu0 %v2152_v52 }
 0x365   : > { %v2117_v44 = vadd.f32 %v3749_v21, %v2097_v46 }
 0x367   : > { %v2133_v39 = vmax.f32 %v2117_v44, 0.0 }
 0x368   : > { %v2024_v24 = vpop.f32.mrf.mxu0 }
 0x369   : > { %v2074_v38 = vadd.f32 %v2073_v59, %v2024_v24  ;;  %v2153_v23 = vmul.f32 %v3756_v57, %v2133_v39 }
 0x36b   : > { %v2098_v60 = vmul.f32 %v3744_v61, %v2074_v38  ;;  %2181 = vadd.xlane.f32.xlu1 %v2153_v23 }
 0x36d   : > { %v2118_v22 = vadd.f32 %v3749_v21, %v2098_v60 }
 0x36f   : > { %v2134_v13 = vmax.f32 %v2118_v22, 0.0 }
 0x370   : > { %v2027_v55 = vpop.f32.mrf.mxu0 }
 0x371   : > { %v2077_v40 = vadd.f32 %v2076_v7, %v2027_v55  ;;  %v2154_v37 = vmul.f32 %v3756_v57, %v2134_v13 }
 0x373   : > { %v2099_v15 = vmul.f32 %v3744_v61, %v2077_v40  ;;  %2183 = vadd.xlane.f32.xlu2 %v2154_v37 }
 0x375   : > { %v2119_v8 = vadd.f32 %v3749_v21, %v2099_v15 }
 0x377   : > { %v2135_v19 = vmax.f32 %v2119_v8, 0.0 }
 0x378   : > { %v2029_v17 = vpop.f32.mrf.mxu0 }
 0x379   : > { %v2079_v26 = vadd.f32 %v2078_v25, %v2029_v17  ;;  %v2155_v2 = vmul.f32 %v3756_v57, %v2135_v19  ;;  %v3973_v19 = vsub.f32 %v3554_v47, %v3324_v48 }
 0x37b   : > { %v2100_v41 = vmul.f32 %v3744_v61, %v2079_v26  ;;  %2185 = vadd.xlane.f32.xlu0 %v2155_v2  ;;  %v3809_v61 = vpop.xlane.xlu0 %1387  ;;  %v1405_v25 = vmul.f32 0.5, %v3973_v19 }
 0x37d   : > { %v2120_v42 = vadd.f32 %v3749_v21, %v2100_v41 }
 0x37e   : > { %v2158_v56 = vpop.xlane.xlu1 %2157 }
 0x37f   : > { %v2136_v50 = vmax.f32 %v2120_v42, 0.0  ;;  %v2193_v10 = vadd.f32 %v2663_v58, %v2158_v56 }
 0x381   : > { %v2156_v6 = vmul.f32 %v3756_v57, %v2136_v50 }
 0x383   : > { %2187 = vadd.xlane.f32.xlu1 %v2156_v6  ;;  %v3974_v6 = vsub.f32 %v3568_v53, %v3345_v18  ;;  %v3977_v18 = vsub.f32 %v3590_v35, %v3355_v1 }
 0x385   : > { %v1406_v56 = vmul.f32 0.5, %v3974_v6  ;;  %v1407_v53 = vmul.f32 0.5, %v3977_v18 }
 0x386   : > { %v2160_v33 = vpop.xlane.xlu2 %2159 }
 0x387   : > { %v2194_v54 = vadd.f32 %v2663_v58, %v2160_v33  ;;  %v3975_v33 = vsub.f32 %v3607_v29, %v3385_v62  ;;  %v3978_v62 = vsub.f32 %v3633_v63, %v3435_v4  ;;  %v3981_v4 = vsub.f32 %v3660_v12, %v3465_v5  ;;  %v3985_v12 = vld [vmem:[#allocation8_spill] sm:$0xff] }
 0x389   : > { %v1415_v63 = vmul.f32 0.5, %v3981_v4 }
 0x38b   : > { %2225 = vrot.lane.b32.xlu2 %v2193_v10, %s2706_s25 }
 0x38e   : > { %v2162_v49 = vpop.xlane.xlu0 %2161 }
 0x38f   : > { %2227 = vrot.lane.b32.xlu0 %v2194_v54, %s2706_s25  ;;  %v2195_v57 = vadd.f32 %v2663_v58, %v2162_v49  ;;  %v1409_v54 = vmul.f32 0.5, %v3975_v33 }
 0x396   : > { %v2164_v21 = vpop.xlane.xlu1 %2163 }
 0x397   : > { %v2196_v51 = vadd.f32 %v2663_v58, %v2164_v21  ;;  %v3976_v21 = vsub.f32 %v3599_v28, %v3375_v30  ;;  %v1412_v30 = vmul.f32 0.5, %v3978_v62 }
 0x399   : > { %2231 = vrot.lane.b32.xlu0 %v2196_v51, %s2706_s25  ;;  %v1408_v49 = vmul.f32 0.5, %v3976_v21 }
 0x39c   : > { %2229 = vrot.lane.b32.xlu1 %v2195_v57, %s2706_s25 }
 0x39e   : > { %v2166_v9 = vpop.xlane.xlu2 %2165 }
 0x39f   : > { %v2197_v34 = vadd.f32 %v2663_v58, %v2166_v9 }
 0x3a1   : > { %2233 = vrot.lane.b32.xlu2 %v2197_v34, %s2706_s25 }
 0x3a6   : > { %v2168_v45 = vpop.xlane.xlu0 %2167 }
 0x3a7   : > { %v2198_v52 = vadd.f32 %v2663_v58, %v2168_v45  ;;  %v3979_v45 = vsub.f32 %v3616_v0, %v3401_v36  ;;  %v3982_v0 = vsub.f32 %v3643_v14, %v3443_v20  ;;  %v3986_v20 = vld [vmem:[#allocation4_spill] sm:$0xff]  ;;  %v3987_v14 = vld [vmem:[#allocation11_spill] sm:$0xff] }
 0x3a9   : > { %2235 = vrot.lane.b32.xlu1 %v2198_v52, %s2706_s25  ;;  %v1410_v52 = vmul.f32 0.5, %v3979_v45 }
 0x3ae   : > { %v2170_v46 = vpop.xlane.xlu1 %2169 }
 0x3af   : > { %v2199_v59 = vadd.f32 %v2663_v58, %v2170_v46  ;;  %v3980_v46 = vsub.f32 %v3624_v31, %v3417_v3  ;;  %v3983_v31 = vld [vmem:[#allocation10_spill] sm:$0xff] }
 0x3b1   : > { %2237 = vrot.lane.b32.xlu0 %v2199_v59, %s2706_s25  ;;  %v1411_v59 = vmul.f32 0.5, %v3980_v46 }
 0x3b6   : > { %v2172_v44 = vpop.xlane.xlu2 %2171 }
 0x3b7   : > { %v2200_v39 = vadd.f32 %v2663_v58, %v2172_v44 }
 0x3b9   : > { %2239 = vrot.lane.b32.xlu2 %v2200_v39, %s2706_s25 }
 0x3be   : > { %v2174_v24 = vpop.xlane.xlu0 %2173 }
 0x3bf   : > { %v2201_v38 = vadd.f32 %v2663_v58, %v2174_v24 }
 0x3c1   : > { %2241 = vrot.lane.b32.xlu1 %v2201_v38, %s2706_s25  ;;  %v1413_v38 = vmul.f32 0.5, %v3982_v0 }
 0x3c6   : > { %v2176_v23 = vpop.xlane.xlu1 %2175 }
 0x3c7   : > { %v2202_v60 = vadd.f32 %v2663_v58, %v2176_v23 }
 0x3c9   : > { %2243 = vrot.lane.b32.xlu0 %v2202_v60, %s2706_s25  ;;  %v3984_v60 = vsub.f32 %v3650_v32, %v3983_v31  ;;  %v3988_v32 = vsub.f32 %v3986_v20, %v3987_v14 }
 0x3ce   : > { %v2178_v22 = vpop.xlane.xlu2 %2177 }
 0x3cf   : > { %v2203_v7 = vadd.f32 %v2663_v58, %v2178_v22  ;;  %v1414_v22 = vmul.f32 0.5, %v3984_v60 }
 0x3d1   : > { %2245 = vrot.lane.b32.xlu2 %v2203_v7, %s2706_s25 }
 0x3d6   : > { %v2180_v13 = vpop.xlane.xlu0 %2179 }
 0x3d7   : > { %v2204_v55 = vadd.f32 %v2663_v58, %v2180_v13  ;;  %v1402_v13 = vsub.f32 %v3803_v27, %v3985_v12 }
 0x3d9   : > { %2247 = vrot.lane.b32.xlu1 %v2204_v55, %s2706_s25  ;;  %v1418_v55 = vmul.f32 0.5, %v1402_v13 }
 0x3de   : > { %v2182_v40 = vpop.xlane.xlu1 %2181 }
 0x3df   : > { %v2205_v37 = vadd.f32 %v2663_v58, %v2182_v40 }
 0x3e1   : > { %2249 = vrot.lane.b32.xlu0 %v2205_v37, %s2706_s25 }
 0x3e6   : > { %v2184_v15 = vpop.xlane.xlu2 %2183 }
 0x3e7   : > { %v2206_v8 = vadd.f32 %v2663_v58, %v2184_v15  ;;  %v1416_v15 = vmul.f32 0.5, %v3988_v32 }
 0x3e9   : > { %2251 = vrot.lane.b32.xlu2 %v2206_v8, %s2706_s25 }
 0x3ee   : > { %v2226_v17 = vpop.permute.xlu2 %2225  ;;  %v2186_v26 = vpop.xlane.xlu0 %2185 }
 0x3ef   : > { %v2273_v2 = vadd.f32 %v2226_v17, %v1405_v25  ;;  %v2207_v41 = vadd.f32 %v2663_v58, %v2186_v26  ;;  %v3989_v25 = vsub.f32 %v3674_v43, %v3496_v16 }
 0x3f1   : > { %2305 = vrot.lane.b32.xlu2 %v2273_v2, %s2707_s26  ;;  %2253 = vrot.lane.b32.xlu1 %v2207_v41, %s2706_s25  ;;  %v1417_v17 = vmul.f32 0.5, %v3989_v25  ;;  %v3990_v41 = vld [vmem:[#allocation3_spill] sm:$0xff] }
 0x3f6   : > { %v2188_v42 = vpop.xlane.xlu1 %2187 }
 0x3f7   : > { %v2208_v50 = vadd.f32 %v2663_v58, %v2188_v42  ;;  %v1403_v42 = vsub.f32 %v3806_v11, %v3990_v41 }
 0x3f9   : > { %2255 = vrot.lane.b32.xlu0 %v2208_v50, %s2706_s25  ;;  %v1419_v50 = vmul.f32 0.5, %v1403_v42 }
 0x3fb   : > { %v2234_v47 = vpop.permute.xlu2 %2233 }
 0x3fc   : > { %v2277_v58 = vadd.f32 %v2234_v47, %v1409_v54 }
 0x401   : > { %v2228_v10 = vpop.permute.xlu0 %2227 }
 0x402   : > { %v2274_v48 = vadd.f32 %v2228_v10, %v1406_v56  ;;  %v3991_v10 = vld [vmem:[#allocation5_spill] sm:$0xff] }
 0x404   : > { %2307 = vrot.lane.b32.xlu1 %v2274_v48, %s2707_s26  ;;  %v1404_v48 = vsub.f32 %v3809_v61, %v3991_v10 }
 0x406   : > { %v1420_v43 = vmul.f32 0.5, %v1404_v48 }
 0x40b   : > { %v2232_v51 = vpop.permute.xlu0 %2231 }
 0x40c   : > { %v2276_v57 = vadd.f32 %v2232_v51, %v1408_v49  ;;  %2313 = vrot.lane.b32.xlu1 %v2277_v58, %s2707_s26 }
 0x40e   : > { %v2230_v9 = vpop.permute.xlu1 %2229  ;;  %2311 = vrot.lane.b32.xlu2 %v2276_v57, %s2707_s26 }
 0x40f   : > { %v2275_v34 = vadd.f32 %v2230_v9, %v1407_v53 }
 0x411   : > { %2309 = vrot.lane.b32.xlu0 %v2275_v34, %s2707_s26 }
 0x413   : > { %v2240_v28 = vpop.permute.xlu2 %2239 }
 0x414   : > { %v2280_v29 = vadd.f32 %v2240_v28, %v1412_v30 }
 0x416   : > { %2319 = vrot.lane.b32.xlu1 %v2280_v29, %s2707_s26 }
 0x41b   : > { %v2236_v1 = vpop.permute.xlu1 %2235 }
 0x41c   : > { %v2278_v35 = vadd.f32 %v2236_v1, %v1410_v52 }
 0x41e   : > { %2315 = vrot.lane.b32.xlu0 %v2278_v35, %s2707_s26 }
 0x423   : > { %v2238_v44 = vpop.permute.xlu0 %2237 }
 0x424   : > { %v2279_v39 = vadd.f32 %v2238_v44, %v1411_v59 }
 0x426   : > { %2317 = vrot.lane.b32.xlu2 %v2279_v39, %s2707_s26 }
 0x42b   : > { %v2246_v24 = vpop.permute.xlu2 %2245 }
 0x42c   : > { %v2283_v36 = vadd.f32 %v2246_v24, %v1415_v63 }
 0x42e   : > { %2325 = vrot.lane.b32.xlu1 %v2283_v36, %s2707_s26 }
 0x433   : > { %v2242_v23 = vpop.permute.xlu1 %2241 }
 0x434   : > { %v2281_v3 = vadd.f32 %v2242_v23, %v1413_v38 }
 0x436   : > { %2321 = vrot.lane.b32.xlu0 %v2281_v3, %s2707_s26 }
 0x43b   : > { %v2244_v7 = vpop.permute.xlu0 %2243 }
 0x43c   : > { %v2282_v5 = vadd.f32 %v2244_v7, %v1414_v22 }
 0x43e   : > { %2323 = vrot.lane.b32.xlu2 %v2282_v5, %s2707_s26 }
 0x443   : > { %v2252_v40 = vpop.permute.xlu2 %2251 }
 0x444   : > { %v2286_v37 = vadd.f32 %v2252_v40, %v1418_v55 }
 0x446   : > { %2331 = vrot.lane.b32.xlu1 %v2286_v37, %s2707_s26 }
 0x44b   : > { %v2306_v8 = vpop.permute.xlu2 %2305  ;;  %v2248_v27 = vpop.permute.xlu1 %2247 }
 0x44c   : > { %2354 = vst.msk [vmem:[%s3877_s29] sm:$0xff] %vm2353_vm1, %v2306_v8  ;;  %v2284_v19 = vadd.f32 %v2248_v27, %v1416_v15 }
 0x44e   : > { %2327 = vrot.lane.b32.xlu0 %v2284_v19, %s2707_s26 }
 0x453   : > { %v2250_v26 = vpop.permute.xlu0 %2249 }
 0x454   : > { %v2285_v2 = vadd.f32 %v2250_v26, %v1417_v17 }
 0x456   : > { %2329 = vrot.lane.b32.xlu2 %v2285_v2, %s2707_s26 }
 0x463   : > { %v2254_v6 = vpop.permute.xlu1 %2253 }
 0x464   : > { %v2287_v56 = vadd.f32 %v2254_v6, %v1419_v50 }
 0x466   : > { %2333 = vrot.lane.b32.xlu0 %v2287_v56, %s2707_s26 }
 0x468   : > { %v2312_v16 = vpop.permute.xlu2 %2311 }
 0x469   : > { %2357 = vst.msk [vmem:[%s3877_s29 + $0x18] sm:$0xff] %vm2353_vm1, %v2312_v16 }
 0x46b   : > { %v2256_v47 = vpop.permute.xlu0 %2255 }
 0x46c   : > { %v2288_v33 = vadd.f32 %v2256_v47, %v1420_v43 }
 0x46e   : > { %2335 = vrot.lane.b32.xlu2 %v2288_v33, %s2707_s26 }
 0x476   : > { %v2308_v11 = vpop.permute.xlu1 %2307 }
 0x477   : > { %2355 = vst.msk [vmem:[%s3877_s29 + $0x8] sm:$0xff] %vm2353_vm1, %v2308_v11 }
 0x47e   : > { %v2314_v54 = vpop.permute.xlu1 %2313 }
 0x47f   : > { %2358 = vst.msk [vmem:[%s3877_s29 + $0x20] sm:$0xff] %vm2353_vm1, %v2314_v54 }
 0x480   : > { %v2318_v61 = vpop.permute.xlu2 %2317 }
 0x481   : > { %2360 = vst.msk [vmem:[%s3877_s29 + $0x30] sm:$0xff] %vm2353_vm1, %v2318_v61 }
 0x483   : > { %v2310_v21 = vpop.permute.xlu0 %2309 }
 0x484   : > { %2356 = vst.msk [vmem:[%s3877_s29 + $0x10] sm:$0xff] %vm2353_vm1, %v2310_v21 }
 0x488   : > { %v2320_v49 = vpop.permute.xlu1 %2319 }
 0x489   : > { %2361 = vst.msk [vmem:[%s3877_s29 + $0x38] sm:$0xff] %vm2353_vm1, %v2320_v49 }
 0x490   : > { %v2316_v58 = vpop.permute.xlu0 %2315 }
 0x491   : > { %2359 = vst.msk [vmem:[%s3877_s29 + $0x28] sm:$0xff] %vm2353_vm1, %v2316_v58 }
 0x498   : > { %v2324_v51 = vpop.permute.xlu2 %2323 }
 0x499   : > { %2363 = vst.msk [vmem:[%s3877_s29 + $0x48] sm:$0xff] %vm2353_vm1, %v2324_v51 }
 0x4a0   : > { %v2326_v57 = vpop.permute.xlu1 %2325 }
 0x4a1   : > { %2364 = vst.msk [vmem:[%s3877_s29 + $0x50] sm:$0xff] %vm2353_vm1, %v2326_v57 }
 0x4a8   : > { %v2322_v18 = vpop.permute.xlu0 %2321 }
 0x4a9   : > { %2362 = vst.msk [vmem:[%s3877_s29 + $0x40] sm:$0xff] %vm2353_vm1, %v2322_v18 }
 0x4b0   : > { %v2330_v53 = vpop.permute.xlu2 %2329 }
 0x4b1   : > { %2366 = vst.msk [vmem:[%s3877_s29 + $0x60] sm:$0xff] %vm2353_vm1, %v2330_v53 }
 0x4b8   : > { %v2332_v9 = vpop.permute.xlu1 %2331 }
 0x4b9   : > { %2367 = vst.msk [vmem:[%s3877_s29 + $0x68] sm:$0xff] %vm2353_vm1, %v2332_v9 }
 0x4c0   : > { %v2328_v34 = vpop.permute.xlu0 %2327 }
 0x4c1   : > { %2365 = vst.msk [vmem:[%s3877_s29 + $0x58] sm:$0xff] %vm2353_vm1, %v2328_v34 }
 0x4c8   : > { %v2336_v62 = vpop.permute.xlu2 %2335 }
 0x4c9   : > { %2369 = vst.msk [vmem:[%s3877_s29 + $0x78] sm:$0xff] %vm2353_vm1, %v2336_v62 }
 0x4d8   : > { %v2334_v30 = vpop.permute.xlu0 %2333 }
 0x4d9   : > { %2368 = vst.msk [vmem:[%s3877_s29 + $0x70] sm:$0xff] %vm2353_vm1, %v2334_v30 }
 0x4da PF: > { %s27_s20 = sadd.s32 1, %s2702_s20  }
 0x4db   : > { %p24_p4 = scmp.ge.s32.totalorder %s27_s20, 4  }
 0x4dd   :  { %26 = sbr.rel (!%p24_p4) target bundleno = 3 (0x3), region = 113 }

</bundles_post_ra>
